<compile_context>
chip_gen: v6e
topology: v6e:2x2x1
jax: 0.10.0
libtpu: 0.0.40
codegen_flags: <defaults>
</compile_context>

<pallas_src>
import functools

import jax
import jax.numpy as jnp
from jax.experimental import pallas as pl
from jax.experimental.pallas import tpu as pltpu

LANE_PAD = 128  # pad the class/logit axis to a full lane width


# ----------------------------------------------------------------------------- kernel
def cheb_pathways_kernel(x_ref, lhat_ref, wc1_ref, bc1_ref, wcs_ref, bcs_ref,
                         pt_ref, wfc_ref, fcb_ref, w1_ref, b1_ref, w2_ref,
                         b2_ref, out_ref):
    """One batch sample per grid step.

    x_ref   : (N, F)            f32   node features of this sample
    lhat_ref: (N, N)            bf16  scaled Laplacian (resident)
    wc1_ref : (2, F, H)         bf16  conv1 thetas (in, out layout)
    bc1_ref : (1, H)            f32   conv1 bias
    wcs_ref : (L-1, 2, H, H)    bf16  extra ChebConv thetas
    bcs_ref : (L-1, 1, H)       f32   extra ChebConv biases
    pt_ref  : (N, n_cmt)        f32   pathway mean-pool matrix, transposed
    wfc_ref : (L, 1, H)         f32   fc weight, de-interleaved per layer (mode='cat')
    fcb_ref : (1, 1)            f32   fc bias
    w1_ref  : (n_cmt, hidden_fc)f32   lin1 weight (transposed)
    b1_ref  : (1, hidden_fc)    f32
    w2_ref  : (hidden_fc, 128)  f32   lin2 weight (transposed, zero-padded)
    b2_ref  : (1, 128)          f32   lin2 bias   (zero-padded)
    out_ref : (1, 128)          f32   padded logits (log_softmax done in XLA)
    """
    f32 = jnp.float32
    bf16 = jnp.bfloat16
    lhat = lhat_ref[...]                                   # (N, N) bf16

    def cheb_conv(h_f32, theta, bias):                     # K = 2 Chebyshev conv
        hb = h_f32.astype(bf16)
        t1 = jnp.dot(lhat, hb, preferred_element_type=f32).astype(bf16)
        out = (jnp.dot(hb, theta[0], preferred_element_type=f32)
               + jnp.dot(t1, theta[1], preferred_element_type=f32)
               + bias)
        return jnp.maximum(out, 0.0)                       # f32 (N, H)

    # conv1 (+ ReLU)
    h = cheb_conv(x_ref[...], wc1_ref[...], bc1_ref[...])
    # mode='cat': fc is linear, so fold it per layer instead of stacking.
    v = jnp.sum(h * wfc_ref[0], axis=-1, keepdims=True)    # (N, 1)

    # remaining ChebConv layers (static small loop, weights VMEM-resident)
    for l in range(wcs_ref.shape[0]):
        h = cheb_conv(h, wcs_ref[l], bcs_ref[l])
        v = v + jnp.sum(h * wfc_ref[l + 1], axis=-1, keepdims=True)

    # pathway scatter_mean (dense pooling matrix) + fc bias  -> (1, n_cmt)
    emb = jnp.sum(pt_ref[...] * v, axis=0, keepdims=True) + fcb_ref[...]

    # head: lin1 -> ReLU -> lin2 (eval mode: dropout = identity)
    hfc = jnp.maximum(
        jnp.dot(emb, w1_ref[...], preferred_element_type=f32) + b1_ref[...], 0.0)
    out_ref[...] = (jnp.dot(hfc, w2_ref[...], preferred_element_type=f32)
                    + b2_ref[...])                         # (1, 128) padded logits


# ----------------------------------------------------------------------------- wrapper
@functools.partial(jax.jit, static_argnames=("n_classes",))
def cheb_pathways_forward(x, kparams, *, n_classes):
    (lhat, wc1, bc1, wcs, bcs, pt, wfc, fcb, w1t, b1, w2tp, b2p) = kparams
    bs, n_nodes, n_feat = x.shape
    hidden_gcn = wc1.shape[-1]
    n_layers = wcs.shape[0] + 1
    n_cmt = pt.shape[-1]
    hidden_fc = w1t.shape[-1]

    ins = (x, lhat, wc1, bc1, wcs, bcs, pt, wfc, fcb, w1t, b1, w2tp, b2p)

    # advisory cost estimate for the XLA scheduler
    per_sample = (2 * n_nodes * n_nodes * n_feat + 4 * n_nodes * n_feat * hidden_gcn
                  + (n_layers - 1) * (2 * n_nodes * n_nodes * hidden_gcn
                                      + 4 * n_nodes * hidden_gcn * hidden_gcn)
                  + 2 * n_nodes * hidden_gcn * n_layers
                  + 2 * n_nodes * n_cmt
                  + 2 * n_cmt * hidden_fc + 2 * hidden_fc * LANE_PAD)
    in_bytes = sum(int(a.size) * a.dtype.itemsize for a in ins)
    cost = pl.CostEstimate(flops=bs * per_sample, transcendentals=0,
                           bytes_accessed=in_bytes + bs * LANE_PAD * 4)

    def const_spec(shape):  # whole array resident across all grid steps
        return pl.BlockSpec(shape, lambda b, _s=shape: (0,) * len(_s))

    in_specs = [
        pl.BlockSpec((None, n_nodes, n_feat), lambda b: (b, 0, 0)),  # x: 1 sample/step
        const_spec(lhat.shape), const_spec(wc1.shape), const_spec(bc1.shape),
        const_spec(wcs.shape), const_spec(bcs.shape), const_spec(pt.shape),
        const_spec(wfc.shape), const_spec(fcb.shape), const_spec(w1t.shape),
        const_spec(b1.shape), const_spec(w2tp.shape), const_spec(b2p.shape),
    ]

    logits_pad = pl.pallas_call(
        cheb_pathways_kernel,
        grid=(bs,),
        in_specs=in_specs,
        out_specs=pl.BlockSpec((None, 1, LANE_PAD), lambda b: (b, 0, 0)),
        out_shape=jax.ShapeDtypeStruct((bs, 1, LANE_PAD), jnp.float32),
        compiler_params=pltpu.CompilerParams(
            dimension_semantics=("parallel",),        # megacore split over batch
            vmem_limit_bytes=64 * 1024 * 1024),
        cost_estimate=cost,
    )(*ins)

    logits = logits_pad[:, 0, :n_classes]
    return jax.nn.log_softmax(logits, axis=-1)


# ----------------------------------------------------------------------------- params
def build_model(key, n_genes, n_features, n_classes, num_layers,
                hidden_gcn, hidden_fc, n_cmt):
    """Build graph, pathway and weights; return (kernel params, reference params)."""
    N = n_genes
    key_iter = iter(jax.random.split(key, 64))
    nk = lambda: next(key_iter)

    # random undirected gene graph -> scaled Laplacian (ChebConv sym, lambda_max=2)
    n_e = 4 * N
    src = jax.random.randint(nk(), (n_e,), 0, N)
    dst = jax.random.randint(nk(), (n_e,), 0, N)
    adj = jnp.zeros((N, N), jnp.float32).at[src, dst].set(1.0)
    adj = jnp.maximum(adj, adj.T) * (1.0 - jnp.eye(N, dtype=jnp.float32))
    deg = adj.sum(axis=1)
    dinv = jnp.where(deg > 0, 1.0 / jnp.sqrt(jnp.maximum(deg, 1e-12)), 0.0)
    a_norm = dinv[:, None] * adj * dinv[None, :]
    lambda_max = 2.0
    lap = jnp.eye(N, dtype=jnp.float32) - a_norm
    lhat = ((2.0 / lambda_max) * lap - jnp.eye(N, dtype=jnp.float32)).astype(jnp.bfloat16)

    # pathway membership (row: gene idx, col: community idx) + dense mean-pool matrix
    n_p = 4 * N
    row = jax.random.randint(nk(), (n_p,), 0, N)
    col = jnp.concatenate([jnp.arange(n_cmt, dtype=jnp.int32),
                           jax.random.randint(nk(), (n_p - n_cmt,), 0, n_cmt)])
    cnt = jnp.zeros((n_cmt,), jnp.float32).at[col].add(1.0)
    pool = jnp.zeros((n_cmt, N), jnp.float32).at[col, row].add(1.0)
    pool = pool / jnp.maximum(cnt, 1.0)[:, None]
    pt = pool.T                                            # (N, n_cmt) f32 (small)

    def lin(kw, kb, fan_in, fan_out):
        bound = 1.0 / jnp.sqrt(fan_in)
        w = jax.random.uniform(kw, (fan_out, fan_in), jnp.float32, -bound, bound)
        b = jax.random.uniform(kb, (fan_out,), jnp.float32, -bound, bound)
        return w, b

    def cheb_weights(fan_in):                              # K = 2 thetas (no per-lin bias)
        t0, _ = lin(nk(), nk(), fan_in, hidden_gcn)
        t1, _ = lin(nk(), nk(), fan_in, hidden_gcn)
        bias = jax.random.uniform(nk(), (1, hidden_gcn), jnp.float32, -0.1, 0.1)
        return jnp.stack([t0.T, t1.T], axis=0).astype(jnp.bfloat16), bias

    wc1, bc1 = cheb_weights(n_features)                    # conv1
    extra = [cheb_weights(hidden_gcn) for _ in range(num_layers - 1)]
    wcs = jnp.stack([w for w, _ in extra], axis=0)         # (L-1, 2, H, H) bf16
    bcs = jnp.stack([b for _, b in extra], axis=0)         # (L-1, 1, H) f32

    # fc: Linear(num_layers*hidden_gcn, 1)  (mode='cat' interleaved feature order)
    d_cat = num_layers * hidden_gcn
    fc_w, fc_b = lin(nk(), nk(), d_cat, 1)
    wfc = fc_w[0].reshape(hidden_gcn, num_layers).T[:, None, :]   # (L, 1, H)
    fcb = fc_b.reshape(1, 1)

    # head
    w1, b1 = lin(nk(), nk(), n_cmt, hidden_fc)
    w2, b2 = lin(nk(), nk(), hidden_fc, n_classes)
    w1t = w1.T
    b1r = b1.reshape(1, hidden_fc)
    w2tp = jnp.zeros((hidden_fc, LANE_PAD), jnp.float32).at[:, :n_classes].set(w2.T)
    b2p = jnp.zeros((1, LANE_PAD), jnp.float32).at[0, :n_classes].set(b2)

    kparams = (lhat, wc1, bc1, wcs, bcs, pt, wfc, fcb, w1t, b1r, w2tp, b2p)
    ref_params = dict(lhat=lhat, wc1=wc1, bc1=bc1, wcs=wcs, bcs=bcs,
                      row=row, col=col, n_cmt=n_cmt,
                      fc_w=fc_w, fc_b=fc_b, w1=w1, b1=b1, w2=w2, b2=b2)
    return kparams, ref_params


# ----------------------------------------------------------------------------- reference
def cheb_pathways_reference(x, p):
    """Pure-JAX mirror of ChebModelWPathways.forward (mode='cat', K=2, eval)."""
    f32, bf16 = jnp.float32, jnp.bfloat16
    bs, n_nodes, _ = x.shape
    lhat = p["lhat"]

    def cheb_conv(h, theta, bias):
        hb = h.astype(bf16)
        t1 = jnp.einsum("nm,bmf->bnf", lhat, hb,
                        preferred_element_type=f32).astype(bf16)
        out = (jnp.einsum("bnf,fh->bnh", hb, theta[0], preferred_element_type=f32)
               + jnp.einsum("bnf,fh->bnh", t1, theta[1], preferred_element_type=f32)
               + bias)
        return jax.nn.relu(out)

    h = cheb_conv(x.astype(f32), p["wc1"], p["bc1"])
    xs = [h]
    for l in range(p["wcs"].shape[0]):
        h = cheb_conv(h, p["wcs"][l], p["bcs"][l])
        xs.append(h)
    xcat = jnp.stack(xs, axis=-1).reshape(bs, n_nodes, -1)       # torch stack(...,-1).view

    # scatter_mean(x.transpose(0,1)[row], col, dim=0)
    g = jnp.transpose(xcat, (1, 0, 2))[p["row"]]                 # (E, bs, D)
    sums = jax.ops.segment_sum(g, p["col"], num_segments=p["n_cmt"])
    counts = jax.ops.segment_sum(jnp.ones(p["col"].shape, f32), p["col"],
                                 num_segments=p["n_cmt"])
    pooled = sums / jnp.maximum(counts, 1.0)[:, None, None]      # (n_cmt, bs, D)
    pooled = jnp.transpose(pooled, (1, 0, 2)).reshape(-1, xcat.shape[-1])

    emb = (pooled @ p["fc_w"].T + p["fc_b"]).reshape(bs, p["n_cmt"])
    hh = jax.nn.relu(emb @ p["w1"].T + p["b1"])
    logits = hh @ p["w2"].T + p["b2"]
    return jax.nn.log_softmax(logits, axis=-1)


# ----------------------------------------------------------------------------- main
if __name__ == "__main__":
    bs = 8
    n_genes = 256
    n_features = 4
    hidden_gcn = 32
    hidden_fc = 64
    n_classes = 10
    n_cmt = 128
    num_layers = 2          # conv1 + one extra ChebConv (mode='cat')

    key = jax.random.PRNGKey(0)
    k_model, k_x = jax.random.split(key)
    kparams, ref_params = build_model(k_model, n_genes, n_features, n_classes,
                                      num_layers, hidden_gcn, hidden_fc, n_cmt)
    x = jax.random.normal(k_x, (bs, n_genes, n_features), dtype=jnp.float32)

    out = cheb_pathways_forward(x, kparams, n_classes=n_classes)
    out = jax.block_until_ready(out)

    ref = cheb_pathways_reference(x, ref_params)
    assert out.shape == (bs, n_classes)
    assert bool(jnp.all(jnp.isfinite(out)))
    max_err = float(jnp.max(jnp.abs(out - ref)))
    assert jnp.allclose(out, ref, atol=1e-2, rtol=1e-2), f"mismatch vs reference: {max_err}"

    print("KERNEL_OK")
</pallas_src>

<mosaic_0001>
module attributes {stable_mosaic.version = 11 : i64} {
  func.func @cheb_pathways_kernel(%arg0: i32, %arg1: memref<1x256x4xf32, #tpu.memory_space<vmem>>, %arg2: memref<256x256xbf16, #tpu.memory_space<vmem>>, %arg3: memref<2x4x32xbf16, #tpu.memory_space<vmem>>, %arg4: memref<1x32xf32, #tpu.memory_space<vmem>>, %arg5: memref<1x2x32x32xbf16, #tpu.memory_space<vmem>>, %arg6: memref<1x1x32xf32, #tpu.memory_space<vmem>>, %arg7: memref<256x128xf32, #tpu.memory_space<vmem>>, %arg8: memref<2x1x32xf32, #tpu.memory_space<vmem>>, %arg9: memref<1x1xf32, #tpu.memory_space<vmem>>, %arg10: memref<128x64xf32, #tpu.memory_space<vmem>>, %arg11: memref<1x64xf32, #tpu.memory_space<vmem>>, %arg12: memref<64x128xf32, #tpu.memory_space<vmem>>, %arg13: memref<1x128xf32, #tpu.memory_space<vmem>>, %arg14: memref<1x1x128xf32, #tpu.memory_space<vmem>>) attributes {dimension_semantics = [#tpu.dimension_semantics<parallel>], iteration_bounds = array<i64: 8>, scalar_prefetch = 0 : i64, scratch_operands = 0 : i64, tpu.core_type = #tpu.core_type<tc>, window_params = [{transform_indices = @transform_0, window_bounds = array<i64: 1, 256, 4>}, {pipeline_mode = #tpu.pipeline_mode<synchronous>, transform_indices = @transform_1, window_bounds = array<i64: 256, 256>}, {pipeline_mode = #tpu.pipeline_mode<synchronous>, transform_indices = @transform_2, window_bounds = array<i64: 2, 4, 32>}, {pipeline_mode = #tpu.pipeline_mode<synchronous>, transform_indices = @transform_3, window_bounds = array<i64: 1, 32>}, {pipeline_mode = #tpu.pipeline_mode<synchronous>, transform_indices = @transform_4, window_bounds = array<i64: 1, 2, 32, 32>}, {pipeline_mode = #tpu.pipeline_mode<synchronous>, transform_indices = @transform_5, window_bounds = array<i64: 1, 1, 32>}, {pipeline_mode = #tpu.pipeline_mode<synchronous>, transform_indices = @transform_6, window_bounds = array<i64: 256, 128>}, {pipeline_mode = #tpu.pipeline_mode<synchronous>, transform_indices = @transform_7, window_bounds = array<i64: 2, 1, 32>}, {pipeline_mode = #tpu.pipeline_mode<synchronous>, transform_indices = @transform_8, window_bounds = array<i64: 1, 1>}, {pipeline_mode = #tpu.pipeline_mode<synchronous>, transform_indices = @transform_9, window_bounds = array<i64: 128, 64>}, {pipeline_mode = #tpu.pipeline_mode<synchronous>, transform_indices = @transform_10, window_bounds = array<i64: 1, 64>}, {pipeline_mode = #tpu.pipeline_mode<synchronous>, transform_indices = @transform_11, window_bounds = array<i64: 64, 128>}, {pipeline_mode = #tpu.pipeline_mode<synchronous>, transform_indices = @transform_12, window_bounds = array<i64: 1, 128>}, {transform_indices = @transform_13, window_bounds = array<i64: 1, 1, 128>}]} {
    %c0 = arith.constant 0 : index
    %c0_0 = arith.constant 0 : index
    %0 = vector.load %arg2[%c0, %c0_0] : memref<256x256xbf16, #tpu.memory_space<vmem>>, vector<256x256xbf16>
    %c0_1 = arith.constant 0 : index
    %c0_2 = arith.constant 0 : index
    %c0_3 = arith.constant 0 : index
    %1 = vector.load %arg1[%c0_1, %c0_2, %c0_3] : memref<1x256x4xf32, #tpu.memory_space<vmem>>, vector<1x256x4xf32>
    %2 = vector.shape_cast %1 : vector<1x256x4xf32> to vector<256x4xf32>
    %c0_4 = arith.constant 0 : index
    %c0_5 = arith.constant 0 : index
    %c0_6 = arith.constant 0 : index
    %3 = vector.load %arg3[%c0_4, %c0_5, %c0_6] : memref<2x4x32xbf16, #tpu.memory_space<vmem>>, vector<2x4x32xbf16>
    %c0_7 = arith.constant 0 : index
    %c0_8 = arith.constant 0 : index
    %4 = vector.load %arg4[%c0_7, %c0_8] : memref<1x32xf32, #tpu.memory_space<vmem>>, vector<1x32xf32>
    %5 = arith.truncf %2 : vector<256x4xf32> to vector<256x4xbf16>
    %cst = arith.constant dense<0.000000e+00> : vector<256x4xf32>
    %6 = tpu.matmul %0, %5, %cst {dimension_numbers = #tpu.dot_dimension_numbers<[1], [0], [0], [1], [0, 0, 1, 1], [], []>} : vector<256x256xbf16>, vector<256x4xbf16>, vector<256x4xf32> -> vector<256x4xf32>
    %7 = arith.truncf %6 : vector<256x4xf32> to vector<256x4xbf16>
    %8 = vector.extract_strided_slice %3 {offsets = [0, 0, 0], sizes = [1, 4, 32], strides = [1, 1, 1]} : vector<2x4x32xbf16> to vector<1x4x32xbf16>
    %9 = vector.shape_cast %8 : vector<1x4x32xbf16> to vector<4x32xbf16>
    %cst_9 = arith.constant dense<0.000000e+00> : vector<256x32xf32>
    %10 = tpu.matmul %5, %9, %cst_9 {dimension_numbers = #tpu.dot_dimension_numbers<[1], [0], [0], [1], [0, 0, 1, 1], [], []>} : vector<256x4xbf16>, vector<4x32xbf16>, vector<256x32xf32> -> vector<256x32xf32>
    %11 = vector.extract_strided_slice %3 {offsets = [1, 0, 0], sizes = [1, 4, 32], strides = [1, 1, 1]} : vector<2x4x32xbf16> to vector<1x4x32xbf16>
    %12 = vector.shape_cast %11 : vector<1x4x32xbf16> to vector<4x32xbf16>
    %cst_10 = arith.constant dense<0.000000e+00> : vector<256x32xf32>
    %13 = tpu.matmul %7, %12, %cst_10 {dimension_numbers = #tpu.dot_dimension_numbers<[1], [0], [0], [1], [0, 0, 1, 1], [], []>} : vector<256x4xbf16>, vector<4x32xbf16>, vector<256x32xf32> -> vector<256x32xf32>
    %14 = arith.addf %10, %13 : vector<256x32xf32>
    %15 = vector.broadcast %4 : vector<1x32xf32> to vector<256x32xf32>
    %16 = arith.addf %14, %15 : vector<256x32xf32>
    %cst_11 = arith.constant 0.000000e+00 : f32
    %17 = vector.broadcast %cst_11 : f32 to vector<256x32xf32>
    %18 = arith.maximumf %16, %17 : vector<256x32xf32>
    %c0_12 = arith.constant 0 : index
    %c0_13 = arith.constant 0 : index
    %c0_14 = arith.constant 0 : index
    %19 = vector.load %arg8[%c0_12, %c0_13, %c0_14] : memref<2x1x32xf32, #tpu.memory_space<vmem>>, vector<1x1x32xf32>
    %20 = vector.shape_cast %19 : vector<1x1x32xf32> to vector<1x32xf32>
    %21 = vector.broadcast %20 : vector<1x32xf32> to vector<256x32xf32>
    %22 = arith.mulf %18, %21 : vector<256x32xf32>
    %cst_15 = arith.constant dense<0.000000e+00> : vector<256xf32>
    %23 = vector.multi_reduction <add>, %22, %cst_15 [1] : vector<256x32xf32> to vector<256xf32>
    %24 = vector.shape_cast %23 : vector<256xf32> to vector<256x1xf32>
    %c0_16 = arith.constant 0 : index
    %c0_17 = arith.constant 0 : index
    %c0_18 = arith.constant 0 : index
    %c0_19 = arith.constant 0 : index
    %25 = vector.load %arg5[%c0_16, %c0_17, %c0_18, %c0_19] : memref<1x2x32x32xbf16, #tpu.memory_space<vmem>>, vector<1x2x32x32xbf16>
    %26 = vector.shape_cast %25 : vector<1x2x32x32xbf16> to vector<2x32x32xbf16>
    %c0_20 = arith.constant 0 : index
    %c0_21 = arith.constant 0 : index
    %c0_22 = arith.constant 0 : index
    %27 = vector.load %arg6[%c0_20, %c0_21, %c0_22] : memref<1x1x32xf32, #tpu.memory_space<vmem>>, vector<1x1x32xf32>
    %28 = vector.shape_cast %27 : vector<1x1x32xf32> to vector<1x32xf32>
    %29 = arith.truncf %18 : vector<256x32xf32> to vector<256x32xbf16>
    %cst_23 = arith.constant dense<0.000000e+00> : vector<256x32xf32>
    %30 = tpu.matmul %0, %29, %cst_23 {dimension_numbers = #tpu.dot_dimension_numbers<[1], [0], [0], [1], [0, 0, 1, 1], [], []>} : vector<256x256xbf16>, vector<256x32xbf16>, vector<256x32xf32> -> vector<256x32xf32>
    %31 = arith.truncf %30 : vector<256x32xf32> to vector<256x32xbf16>
    %32 = vector.extract_strided_slice %26 {offsets = [0, 0, 0], sizes = [1, 32, 32], strides = [1, 1, 1]} : vector<2x32x32xbf16> to vector<1x32x32xbf16>
    %33 = vector.shape_cast %32 : vector<1x32x32xbf16> to vector<32x32xbf16>
    %cst_24 = arith.constant dense<0.000000e+00> : vector<256x32xf32>
    %34 = tpu.matmul %29, %33, %cst_24 {dimension_numbers = #tpu.dot_dimension_numbers<[1], [0], [0], [1], [0, 0, 1, 1], [], []>} : vector<256x32xbf16>, vector<32x32xbf16>, vector<256x32xf32> -> vector<256x32xf32>
    %35 = vector.extract_strided_slice %26 {offsets = [1, 0, 0], sizes = [1, 32, 32], strides = [1, 1, 1]} : vector<2x32x32xbf16> to vector<1x32x32xbf16>
    %36 = vector.shape_cast %35 : vector<1x32x32xbf16> to vector<32x32xbf16>
    %cst_25 = arith.constant dense<0.000000e+00> : vector<256x32xf32>
    %37 = tpu.matmul %31, %36, %cst_25 {dimension_numbers = #tpu.dot_dimension_numbers<[1], [0], [0], [1], [0, 0, 1, 1], [], []>} : vector<256x32xbf16>, vector<32x32xbf16>, vector<256x32xf32> -> vector<256x32xf32>
    %38 = arith.addf %34, %37 : vector<256x32xf32>
    %39 = vector.broadcast %28 : vector<1x32xf32> to vector<256x32xf32>
    %40 = arith.addf %38, %39 : vector<256x32xf32>
    %cst_26 = arith.constant 0.000000e+00 : f32
    %41 = vector.broadcast %cst_26 : f32 to vector<256x32xf32>
    %42 = arith.maximumf %40, %41 : vector<256x32xf32>
    %c1 = arith.constant 1 : index
    %c0_27 = arith.constant 0 : index
    %c0_28 = arith.constant 0 : index
    %43 = vector.load %arg8[%c1, %c0_27, %c0_28] : memref<2x1x32xf32, #tpu.memory_space<vmem>>, vector<1x1x32xf32>
    %44 = vector.shape_cast %43 : vector<1x1x32xf32> to vector<1x32xf32>
    %45 = vector.broadcast %44 : vector<1x32xf32> to vector<256x32xf32>
    %46 = arith.mulf %42, %45 : vector<256x32xf32>
    %cst_29 = arith.constant dense<0.000000e+00> : vector<256xf32>
    %47 = vector.multi_reduction <add>, %46, %cst_29 [1] : vector<256x32xf32> to vector<256xf32>
    %48 = vector.shape_cast %47 : vector<256xf32> to vector<256x1xf32>
    %49 = arith.addf %24, %48 : vector<256x1xf32>
    %c0_30 = arith.constant 0 : index
    %c0_31 = arith.constant 0 : index
    %50 = vector.load %arg7[%c0_30, %c0_31] : memref<256x128xf32, #tpu.memory_space<vmem>>, vector<256x128xf32>
    %51 = vector.broadcast %49 : vector<256x1xf32> to vector<256x128xf32>
    %52 = arith.mulf %50, %51 : vector<256x128xf32>
    %cst_32 = arith.constant dense<0.000000e+00> : vector<128xf32>
    %53 = vector.multi_reduction <add>, %52, %cst_32 [0] : vector<256x128xf32> to vector<128xf32>
    %54 = vector.shape_cast %53 : vector<128xf32> to vector<1x128xf32>
    %c0_33 = arith.constant 0 : index
    %c0_34 = arith.constant 0 : index
    %55 = vector.load %arg9[%c0_33, %c0_34] : memref<1x1xf32, #tpu.memory_space<vmem>>, vector<1x1xf32>
    %56 = vector.broadcast %55 : vector<1x1xf32> to vector<1x128xf32>
    %57 = arith.addf %54, %56 : vector<1x128xf32>
    %c0_35 = arith.constant 0 : index
    %c0_36 = arith.constant 0 : index
    %58 = vector.load %arg10[%c0_35, %c0_36] : memref<128x64xf32, #tpu.memory_space<vmem>>, vector<128x64xf32>
    %cst_37 = arith.constant dense<0.000000e+00> : vector<1x64xf32>
    %59 = tpu.matmul %57, %58, %cst_37 {dimension_numbers = #tpu.dot_dimension_numbers<[1], [0], [0], [1], [0, 0, 1, 1], [], []>} : vector<1x128xf32>, vector<128x64xf32>, vector<1x64xf32> -> vector<1x64xf32>
    %c0_38 = arith.constant 0 : index
    %c0_39 = arith.constant 0 : index
    %60 = vector.load %arg11[%c0_38, %c0_39] : memref<1x64xf32, #tpu.memory_space<vmem>>, vector<1x64xf32>
    %61 = arith.addf %59, %60 : vector<1x64xf32>
    %cst_40 = arith.constant 0.000000e+00 : f32
    %62 = vector.broadcast %cst_40 : f32 to vector<1x64xf32>
    %63 = arith.maximumf %61, %62 : vector<1x64xf32>
    %c0_41 = arith.constant 0 : index
    %c0_42 = arith.constant 0 : index
    %64 = vector.load %arg12[%c0_41, %c0_42] : memref<64x128xf32, #tpu.memory_space<vmem>>, vector<64x128xf32>
    %cst_43 = arith.constant dense<0.000000e+00> : vector<1x128xf32>
    %65 = tpu.matmul %63, %64, %cst_43 {dimension_numbers = #tpu.dot_dimension_numbers<[1], [0], [0], [1], [0, 0, 1, 1], [], []>} : vector<1x64xf32>, vector<64x128xf32>, vector<1x128xf32> -> vector<1x128xf32>
    %c0_44 = arith.constant 0 : index
    %c0_45 = arith.constant 0 : index
    %66 = vector.load %arg13[%c0_44, %c0_45] : memref<1x128xf32, #tpu.memory_space<vmem>>, vector<1x128xf32>
    %67 = arith.addf %65, %66 : vector<1x128xf32>
    %c0_46 = arith.constant 0 : index
    %c0_47 = arith.constant 0 : index
    %c0_48 = arith.constant 0 : index
    %68 = vector.load %arg14[%c0_46, %c0_47, %c0_48] : memref<1x1x128xf32, #tpu.memory_space<vmem>>, vector<1x1x128xf32>
    %69 = vector.shape_cast %68 : vector<1x1x128xf32> to vector<1x128xf32>
    %70 = vector.shape_cast %67 : vector<1x128xf32> to vector<1x1x128xf32>
    tpu.vector_store %arg14[%c0_46, %c0_47, %c0_48], %70 {strides = array<i32>} : memref<1x1x128xf32, #tpu.memory_space<vmem>>, vector<1x1x128xf32>,
    return
  }
  func.func @transform_0(%arg0: i32) -> (i32, i32, i32) {
    %c0_i32 = arith.constant 0 : i32
    %c0_i32_0 = arith.constant 0 : i32
    %c0_i32_1 = arith.constant 0 : i32
    return %arg0, %c0_i32, %c0_i32_0 : i32, i32, i32
  }
  func.func @transform_1(%arg0: i32) -> (i32, i32) {
    %c0_i32 = arith.constant 0 : i32
    %c0_i32_0 = arith.constant 0 : i32
    %c0_i32_1 = arith.constant 0 : i32
    return %c0_i32, %c0_i32_0 : i32, i32
  }
  func.func @transform_2(%arg0: i32) -> (i32, i32, i32) {
    %c0_i32 = arith.constant 0 : i32
    %c0_i32_0 = arith.constant 0 : i32
    %c0_i32_1 = arith.constant 0 : i32
    %c0_i32_2 = arith.constant 0 : i32
    return %c0_i32, %c0_i32_0, %c0_i32_1 : i32, i32, i32
  }
  func.func @transform_3(%arg0: i32) -> (i32, i32) {
    %c0_i32 = arith.constant 0 : i32
    %c0_i32_0 = arith.constant 0 : i32
    %c0_i32_1 = arith.constant 0 : i32
    return %c0_i32, %c0_i32_0 : i32, i32
  }
  func.func @transform_4(%arg0: i32) -> (i32, i32, i32, i32) {
    %c0_i32 = arith.constant 0 : i32
    %c0_i32_0 = arith.constant 0 : i32
    %c0_i32_1 = arith.constant 0 : i32
    %c0_i32_2 = arith.constant 0 : i32
    %c0_i32_3 = arith.constant 0 : i32
    return %c0_i32, %c0_i32_0, %c0_i32_1, %c0_i32_2 : i32, i32, i32, i32
  }
  func.func @transform_5(%arg0: i32) -> (i32, i32, i32) {
    %c0_i32 = arith.constant 0 : i32
    %c0_i32_0 = arith.constant 0 : i32
    %c0_i32_1 = arith.constant 0 : i32
    %c0_i32_2 = arith.constant 0 : i32
    return %c0_i32, %c0_i32_0, %c0_i32_1 : i32, i32, i32
  }
  func.func @transform_6(%arg0: i32) -> (i32, i32) {
    %c0_i32 = arith.constant 0 : i32
    %c0_i32_0 = arith.constant 0 : i32
    %c0_i32_1 = arith.constant 0 : i32
    return %c0_i32, %c0_i32_0 : i32, i32
  }
  func.func @transform_7(%arg0: i32) -> (i32, i32, i32) {
    %c0_i32 = arith.constant 0 : i32
    %c0_i32_0 = arith.constant 0 : i32
    %c0_i32_1 = arith.constant 0 : i32
    %c0_i32_2 = arith.constant 0 : i32
    return %c0_i32, %c0_i32_0, %c0_i32_1 : i32, i32, i32
  }
  func.func @transform_8(%arg0: i32) -> (i32, i32) {
    %c0_i32 = arith.constant 0 : i32
    %c0_i32_0 = arith.constant 0 : i32
    %c0_i32_1 = arith.constant 0 : i32
    return %c0_i32, %c0_i32_0 : i32, i32
  }
  func.func @transform_9(%arg0: i32) -> (i32, i32) {
    %c0_i32 = arith.constant 0 : i32
    %c0_i32_0 = arith.constant 0 : i32
    %c0_i32_1 = arith.constant 0 : i32
    return %c0_i32, %c0_i32_0 : i32, i32
  }
  func.func @transform_10(%arg0: i32) -> (i32, i32) {
    %c0_i32 = arith.constant 0 : i32
    %c0_i32_0 = arith.constant 0 : i32
    %c0_i32_1 = arith.constant 0 : i32
    return %c0_i32, %c0_i32_0 : i32, i32
  }
  func.func @transform_11(%arg0: i32) -> (i32, i32) {
    %c0_i32 = arith.constant 0 : i32
    %c0_i32_0 = arith.constant 0 : i32
    %c0_i32_1 = arith.constant 0 : i32
    return %c0_i32, %c0_i32_0 : i32, i32
  }
  func.func @transform_12(%arg0: i32) -> (i32, i32) {
    %c0_i32 = arith.constant 0 : i32
    %c0_i32_0 = arith.constant 0 : i32
    %c0_i32_1 = arith.constant 0 : i32
    return %c0_i32, %c0_i32_0 : i32, i32
  }
  func.func @transform_13(%arg0: i32) -> (i32, i32, i32) {
    %c0_i32 = arith.constant 0 : i32
    %c0_i32_0 = arith.constant 0 : i32
    %c0_i32_1 = arith.constant 0 : i32
    return %arg0, %c0_i32, %c0_i32_0 : i32, i32, i32
  }
}

</mosaic_0001>

<bundles_post_ra>
// kernel: cheb_pathways_forward.1
= control target key start
LH: loop header
LB: loop body
LE: loop exit
PB: predicated region body
PF: predicated region fallthrough
CT: control target
= control target key end

     0   :  { %s3485_s27 = smov 0   ;;  %s4842_s0 = inlined_call_operand.vmem [shape: f32[8,256,4], index: 0, kind: input, shape index: {}]   ;;  %s4843_s1 = inlined_call_operand.vmem [shape: bf16[256,256], index: 1, kind: input, shape index: {}]   ;;  %s4844_s2 = inlined_call_operand.vmem [shape: bf16[2,4,32], index: 2, kind: input, shape index: {}]   ;;  %s4845_s3 = inlined_call_operand.vmem [shape: f32[1,32], index: 3, kind: input, shape index: {}]   ;;  %s4846_s4 = inlined_call_operand.vmem [shape: bf16[1,2,32,32], index: 4, kind: input, shape index: {}]   ;;  %s4847_s5 = inlined_call_operand.vmem [shape: f32[1,1,32], index: 5, kind: input, shape index: {}]   ;;  %s4848_s6 = inlined_call_operand.vmem [shape: f32[256,128], index: 6, kind: input, shape index: {}]   ;;  %s4849_s7 = inlined_call_operand.vmem [shape: f32[2,1,32], index: 7, kind: input, shape index: {}]   ;;  %s4850_s8 = inlined_call_operand.<no memory space> [shape: f32[1,1], index: 8, kind: input, shape index: {}]   ;;  %s4851_s9 = inlined_call_operand.vmem [shape: f32[128,64], index: 9, kind: input, shape index: {}]   ;;  %s4852_s10 = inlined_call_operand.vmem [shape: f32[1,64], index: 10, kind: input, shape index: {}]   ;;  %s4853_s11 = inlined_call_operand.vmem [shape: f32[64,128], index: 11, kind: input, shape index: {}]   ;;  %s4854_s12 = inlined_call_operand.vmem [shape: f32[1,128], index: 12, kind: input, shape index: {}]   ;;  %s4855_s13 = inlined_call_operand.vmem [shape: f32[8,1,128], index: 13, kind: output, shape index: {}]  }
   0x1   :  { %v18_v0 = vstv %s4850_s8 }
   0x2   :  { %19 = vst [vmem:[#allocation2] sm:$0x1] %v18_v0 }
   0x3 LB: > { %s2705_s28 = sadd.s32 4294967295, %s3407_s27   ;;  %p2709_p0 = scmp.ge.s32.totalorder %s3407_s27, 1  ;;  %s3407_s27 = sphi %s3485_s27, %s25_s27  }
   0x4   : > { %p389_p1 = scmp.lt.s32.totalorder %s3407_s27, 9 }
   0x6   : > { %p390_p2 = pnand %p2709_p0, %p389_p1 }
   0x8   : > { %393 = sbr.rel (%p390_p2) target bundleno = 1885 (0x75d), region = 72 }
   0xd   : > { %p431_p3 = scmp.lt.s32.totalorder %s2705_s28, 7  ;;  %v3496_v1 = vld [vmem:[%s4843_s1 + $0x4] ss:$8 sps:$4 sm:$0xff]   ;;  %v3589_v50 = vld [vmem:[%s4843_s1] ss:$8 sps:$4 sm:$0xff]   ;;  %vm909_vm0 = vcmask 1041408  }
   0xe   : > { %715 = vmatprep.mubr.bf16.mxu0 %v3496_v1  ;;  %v3595_v51 = vld [vmem:[%s4843_s1 + $0x14] ss:$8 sps:$4 sm:$0xff]   ;;  %v3602_v52 = vld [vmem:[%s4843_s1 + $0x10] ss:$8 sps:$4 sm:$0xff]   ;;  %v3607_v53 = vld [vmem:[%s4843_s1 + $0x24] ss:$8 sps:$4 sm:$0xff]  }
   0xf   : > { %s4962_s28 = smov (!%p431_p3, %s2705_s28), 7  ;;  %v3614_v54 = vld [vmem:[%s4843_s1 + $0x20] ss:$8 sps:$4 sm:$0xff]   ;;  %v3619_v55 = vld [vmem:[%s4843_s1 + $0x34] ss:$8 sps:$4 sm:$0xff]   ;;  %vm860_vm1 = vcmask 31744  }
  0x10   : > { %s2820_s8 = sshll.u32 %s4962_s28, 8  ;;  %v3626_v56 = vld [vmem:[%s4843_s1 + $0x30] ss:$8 sps:$4 sm:$0xff]   ;;  %v3631_v57 = vld [vmem:[%s4843_s1 + $0x44] ss:$8 sps:$4 sm:$0xff]   ;;  %vm1395_vm2 = vcmask 261120   ;;  %s438_s25 = scalar_lea.vmem %s4855_s13, %s4962_s28 }
  0x11   : > { %s3505_s16 = scalar_lea.vmem %s4842_s0, %s2820_s8  ;;  %v3638_v58 = vld [vmem:[%s4843_s1 + $0x40] ss:$8 sps:$4 sm:$0xff]   ;;  %v3643_v59 = vld [vmem:[%s4843_s1 + $0x54] ss:$8 sps:$4 sm:$0xff]   ;;  %v3650_v60 = vld [vmem:[%s4843_s1 + $0x50] ss:$8 sps:$4 sm:$0xff]  }
  0x12   : > { %v502_v2 = vld [vmem:[%s3505_s16 + $0xf0] sm:$0xff]  ;;  %v503_v3 = vld [vmem:[%s3505_s16 + $0xf8] sm:$0xff]  ;;  %v500_v7 = vld [vmem:[%s3505_s16 + $0xe0] sm:$0xff]  ;;  %4888 = vst [vmem:[#allocation3_spill] sm:$0xff] %v3638_v58  ;;  %vm3411_vm3 = vmmov 0   ;;  %vm2583_vm4 = vcmask 523264  }
  0x13   : > { %v486_v4 = vld [vmem:[%s3505_s16 + $0x70] sm:$0xff]  ;;  %v3510_v5 = vpack.c.bf16 %v503_v3, %v502_v2  ;;  %v487_v6 = vld [vmem:[%s3505_s16 + $0x78] sm:$0xff]  ;;  %v501_v8 = vld [vmem:[%s3505_s16 + $0xe8] sm:$0xff]  ;;  %4889 = vst [vmem:[#allocation4_spill] sm:$0xff] %v3643_v59 }
  0x14   : > { %v3515_v9 = vpack.c.bf16 %v487_v6, %v486_v4  ;;  %v3517_v10 = vpack.c.bf16 %v501_v8, %v500_v7  ;;  %v484_v11 = vld [vmem:[%s3505_s16 + $0x60] sm:$0xff]  ;;  %v485_v12 = vld [vmem:[%s3505_s16 + $0x68] sm:$0xff]  ;;  %v498_v13 = vld [vmem:[%s3505_s16 + $0xd0] sm:$0xff]  ;;  %4890 = vst [vmem:[#allocation5_spill] sm:$0xff] %v3650_v60 }
  0x15   : > { %2821 = vmatprep.subr.bf16.mxu0 %v3510_v5  ;;  %v499_v14 = vld [vmem:[%s3505_s16 + $0xd8] sm:$0xff]  ;;  %v3525_v15 = vpack.c.bf16 %v485_v12, %v484_v11  ;;  %v482_v17 = vld [vmem:[%s3505_s16 + $0x50] sm:$0xff]  ;;  %v496_v19 = vld [vmem:[%s3505_s16 + $0xc0] sm:$0xff] }
  0x16   : > { %2822 = vmatpush3.bf16.msra.mxu0 %v3515_v9  ;;  %v3528_v16 = vpack.c.bf16 %v499_v14, %v498_v13  ;;  %v483_v18 = vld [vmem:[%s3505_s16 + $0x58] sm:$0xff]  ;;  %v497_v20 = vld [vmem:[%s3505_s16 + $0xc8] sm:$0xff]  ;;  %v480_v23 = vld [vmem:[%s3505_s16 + $0x40] sm:$0xff] }
  0x17   : > { %2823 = vmatprep.subr.bf16.mxu0 %v3517_v10  ;;  %v3535_v21 = vpack.c.bf16 %v483_v18, %v482_v17  ;;  %v3538_v22 = vpack.c.bf16 %v497_v20, %v496_v19  ;;  %v481_v24 = vld [vmem:[%s3505_s16 + $0x48] sm:$0xff]  ;;  %v494_v25 = vld [vmem:[%s3505_s16 + $0xb0] sm:$0xff]  ;;  %v495_v26 = vld [vmem:[%s3505_s16 + $0xb8] sm:$0xff] }
  0x18   : > { %v3545_v27 = vpack.c.bf16 %v481_v24, %v480_v23  ;;  %v478_v28 = vld [vmem:[%s3505_s16 + $0x30] sm:$0xff]  ;;  %v3549_v29 = vpack.c.bf16 %v495_v26, %v494_v25  ;;  %v479_v30 = vld [vmem:[%s3505_s16 + $0x38] sm:$0xff]  ;;  %v492_v31 = vld [vmem:[%s3505_s16 + $0xa0] sm:$0xff] }
  0x19   : > { %v493_v32 = vld [vmem:[%s3505_s16 + $0xa8] sm:$0xff]  ;;  %v3555_v33 = vpack.c.bf16 %v479_v30, %v478_v28  ;;  %v476_v34 = vld [vmem:[%s3505_s16 + $0x20] sm:$0xff]  ;;  %v490_v37 = vld [vmem:[%s3505_s16 + $0x90] sm:$0xff] }
  0x1a   : > { %2824 = vmatpush3.bf16.msra.mxu0 %v3525_v15  ;;  %v3559_v35 = vpack.c.bf16 %v493_v32, %v492_v31  ;;  %v477_v36 = vld [vmem:[%s3505_s16 + $0x28] sm:$0xff]  ;;  %v491_v38 = vld [vmem:[%s3505_s16 + $0x98] sm:$0xff]  ;;  %v474_v40 = vld [vmem:[%s3505_s16 + $0x10] sm:$0xff] }
  0x1b   : > { %2825 = vmatprep.subr.bf16.mxu0 %v3528_v16  ;;  %v3565_v39 = vpack.c.bf16 %v477_v36, %v476_v34  ;;  %v3569_v41 = vpack.c.bf16 %v491_v38, %v490_v37  ;;  %v475_v42 = vld [vmem:[%s3505_s16 + $0x18] sm:$0xff]  ;;  %v488_v43 = vld [vmem:[%s3505_s16 + $0x80] sm:$0xff]  ;;  %v489_v44 = vld [vmem:[%s3505_s16 + $0x88] sm:$0xff] }
  0x1c   : > { %v3575_v45 = vpack.c.bf16 %v475_v42, %v474_v40  ;;  %v3578_v46 = vpack.c.bf16 %v489_v44, %v488_v43  ;;  %v472_v47 = vld [vmem:[%s3505_s16] sm:$0xff]  ;;  %v473_v48 = vld [vmem:[%s3505_s16 + $0x8] sm:$0xff]  ;;  %v3667_v63 = vld [vmem:[%s4843_s1 + $0x74] ss:$8 sps:$4 sm:$0xff]  }
  0x1d   : > { %v3583_v49 = vpack.c.bf16 %v473_v48, %v472_v47  ;;  %v3655_v61 = vld [vmem:[%s4843_s1 + $0x64] ss:$8 sps:$4 sm:$0xff]   ;;  %v3662_v62 = vld [vmem:[%s4843_s1 + $0x60] ss:$8 sps:$4 sm:$0xff]   ;;  %4893 = vst [vmem:[#allocation8_spill] sm:$0xff] %v3667_v63 }
  0x1e   : > { %2826 = vmatpush3.bf16.msra.mxu0 %v3535_v21  ;;  %4891 = vst [vmem:[#allocation6_spill] sm:$0xff] %v3655_v61  ;;  %4892 = vst [vmem:[#allocation7_spill] sm:$0xff] %v3662_v62  ;;  %v3674_v0 = vld [vmem:[%s4843_s1 + $0x70] ss:$8 sps:$4 sm:$0xff]   ;;  %v3679_v2 = vld [vmem:[%s4843_s1 + $0x84] ss:$8 sps:$4 sm:$0xff]  }
  0x1f   : > { %2827 = vmatprep.subr.bf16.mxu0 %v3538_v22  ;;  %4894 = vst [vmem:[#allocation9_spill] sm:$0xff] %v3674_v0  ;;  %4895 = vst [vmem:[#allocation10_spill] sm:$0xff] %v3679_v2  ;;  %v3686_v3 = vld [vmem:[%s4843_s1 + $0x80] ss:$8 sps:$4 sm:$0xff]   ;;  %v3691_v4 = vld [vmem:[%s4843_s1 + $0x94] ss:$8 sps:$4 sm:$0xff]  }
  0x20   : > { %4896 = vst [vmem:[#allocation11_spill] sm:$0xff] %v3686_v3  ;;  %4897 = vst [vmem:[#allocation12_spill] sm:$0xff] %v3691_v4  ;;  %v3698_v6 = vld [vmem:[%s4843_s1 + $0x90] ss:$8 sps:$4 sm:$0xff]   ;;  %v3703_v7 = vld [vmem:[%s4843_s1 + $0xa4] ss:$8 sps:$4 sm:$0xff]  }
  0x21   : > { %4898 = vst [vmem:[#allocation13_spill] sm:$0xff] %v3698_v6  ;;  %4899 = vst [vmem:[#allocation14_spill] sm:$0xff] %v3703_v7  ;;  %v3710_v8 = vld [vmem:[%s4843_s1 + $0xa0] ss:$8 sps:$4 sm:$0xff]   ;;  %v3715_v11 = vld [vmem:[%s4843_s1 + $0xb4] ss:$8 sps:$4 sm:$0xff]  }
  0x22   : > { %2828 = vmatpush3.bf16.msra.mxu0 %v3545_v27  ;;  %4900 = vst [vmem:[#allocation15_spill] sm:$0xff] %v3710_v8  ;;  %4901 = vst [vmem:[#allocation16_spill] sm:$0xff] %v3715_v11  ;;  %v505_v12 = vld [vmem:[%s4844_s2 + $0x2] sm:$0x3]  ;;  %v3727_v14 = vld [vmem:[%s4843_s1 + $0xb0] ss:$8 sps:$4 sm:$0xff]  }
  0x23   : > { %2829 = vmatprep.subr.bf16.mxu0 %v3549_v29  ;;  %3335 = vmatprep.subr.msk.bf16.mxu1 %vm909_vm0, %v505_v12  ;;  %v911_v13 = vsel %vm909_vm0, %v505_v12, 0  ;;  %4902 = vst [vmem:[#allocation17_spill] sm:$0xff] %v3727_v14  ;;  %v3732_v17 = vld [vmem:[%s4843_s1 + $0xc4] ss:$8 sps:$4 sm:$0xff]   ;;  %v3739_v18 = vld [vmem:[%s4843_s1 + $0xc0] ss:$8 sps:$4 sm:$0xff]  }
  0x24   : > { %3142 = vmatpush3.bf16.msra.mxu1 %v911_v13  ;;  %4903 = vst [vmem:[#allocation18_spill] sm:$0xff] %v3732_v17  ;;  %4904 = vst [vmem:[#allocation19_spill] sm:$0xff] %v3739_v18  ;;  %v3744_v19 = vld [vmem:[%s4843_s1 + $0xd4] ss:$8 sps:$4 sm:$0xff]   ;;  %v3751_v20 = vld [vmem:[%s4843_s1 + $0xd0] ss:$8 sps:$4 sm:$0xff]  }
  0x25   : > { %4905 = vst [vmem:[#allocation20_spill] sm:$0xff] %v3744_v19  ;;  %4906 = vst [vmem:[#allocation21_spill] sm:$0xff] %v3751_v20  ;;  %v3756_v23 = vld [vmem:[%s4843_s1 + $0xe4] ss:$8 sps:$4 sm:$0xff]   ;;  %v3763_v24 = vld [vmem:[%s4843_s1 + $0xe0] ss:$8 sps:$4 sm:$0xff]  }
  0x26   : > { %2830 = vmatpush3.bf16.msra.mxu0 %v3555_v33  ;;  %4907 = vst [vmem:[#allocation22_spill] sm:$0xff] %v3756_v23  ;;  %4908 = vst [vmem:[#allocation23_spill] sm:$0xff] %v3763_v24  ;;  %v3768_v25 = vld [vmem:[%s4843_s1 + $0xf4] ss:$8 sps:$4 sm:$0xff]   ;;  %v3775_v26 = vld [vmem:[%s4843_s1 + $0xf0] ss:$8 sps:$4 sm:$0xff]  }
  0x27   : > { %2831 = vmatprep.subr.bf16.mxu0 %v3559_v35  ;;  %4909 = vst [vmem:[#allocation24_spill] sm:$0xff] %v3768_v25  ;;  %4910 = vst [vmem:[#allocation25_spill] sm:$0xff] %v3775_v26  ;;  %v504_v28 = vld [vmem:[%s4844_s2] sm:$0x3] }
  0x28   : > { %3336 = vmatprep.subr.msk.bf16.mxu1 %vm909_vm0, %v504_v28 }
  0x2a   : > { %2832 = vmatpush3.bf16.msra.mxu0 %v3565_v39 }
  0x2b   : > { %2833 = vmatprep.subr.bf16.mxu0 %v3569_v41 }
  0x2e   : > { %2834 = vmatpush3.bf16.msra.mxu0 %v3575_v45 }
  0x2f   : > { %2835 = vmatprep.subr.bf16.mxu0 %v3578_v46 }
  0x32   : > { %2836 = vmatpush3.bf16.msra.mxu0 %v3583_v49 }
  0x35   : > { %716 = vmatmul.mubr.bf16.vlgmr.msra.gmra.mxu0 %v3589_v50 }
  0x36   : > { %723 = vmatprep.mubr.bf16.mxu0 %v3595_v51 }
  0x3d   : > { %724 = vmatmul.mubr.bf16.gmra.mxu0 %v3602_v52 }
  0x3e   : > { %731 = vmatprep.mubr.bf16.mxu0 %v3607_v53 }
  0x45   : > { %732 = vmatmul.mubr.bf16.gmra.mxu0 %v3614_v54 }
  0x46   : > { %739 = vmatprep.mubr.bf16.mxu0 %v3619_v55 }
  0x4d   : > { %740 = vmatmul.mubr.bf16.gmra.mxu0 %v3626_v56 }
  0x4e   : > { %747 = vmatprep.mubr.bf16.mxu0 %v3631_v57 }
  0x55   : > { %748 = vmatmul.mubr.bf16.gmra.mxu0 %v3638_v58 }
  0x56   : > { %755 = vmatprep.mubr.bf16.mxu0 %v3643_v59 }
  0x5d   : > { %756 = vmatmul.mubr.bf16.gmra.mxu0 %v3650_v60 }
  0x5e   : > { %763 = vmatprep.mubr.bf16.mxu0 %v3655_v61 }
  0x65   : > { %764 = vmatmul.mubr.bf16.gmra.mxu0 %v3662_v62 }
  0x66   : > { %771 = vmatprep.mubr.bf16.mxu0 %v3667_v63 }
  0x6d   : > { %772 = vmatmul.mubr.bf16.gmra.mxu0 %v3674_v0 }
  0x6e   : > { %779 = vmatprep.mubr.bf16.mxu0 %v3679_v2 }
  0x75   : > { %780 = vmatmul.mubr.bf16.gmra.mxu0 %v3686_v3 }
  0x76   : > { %787 = vmatprep.mubr.bf16.mxu0 %v3691_v4 }
  0x7d   : > { %788 = vmatmul.mubr.bf16.gmra.mxu0 %v3698_v6 }
  0x7e   : > { %795 = vmatprep.mubr.bf16.mxu0 %v3703_v7 }
  0x85   : > { %796 = vmatmul.mubr.bf16.gmra.mxu0 %v3710_v8 }
  0x86   : > { %803 = vmatprep.mubr.bf16.mxu0 %v3715_v11 }
  0x8d   : > { %804 = vmatmul.mubr.bf16.gmra.mxu0 %v3727_v14 }
  0x8e   : > { %811 = vmatprep.mubr.bf16.mxu0 %v3732_v17 }
  0x95   : > { %812 = vmatmul.mubr.bf16.gmra.mxu0 %v3739_v18  ;;  %v3893_v18 = vld [vmem:[%s4849_s7] ss:$0 sm:$0xff] }
  0x96   : > { %819 = vmatprep.mubr.bf16.mxu0 %v3744_v19 }
  0x9d   : > { %820 = vmatmul.mubr.bf16.gmra.mxu0 %v3751_v20 }
  0x9e   : > { %827 = vmatprep.mubr.bf16.mxu0 %v3756_v23 }
  0xa5   : > { %828 = vmatmul.mubr.bf16.gmra.mxu0 %v3763_v24 }
  0xa6   : > { %835 = vmatprep.mubr.bf16.mxu0 %v3768_v25 }
  0xad   : > { %836 = vmatmul.mubr.bf16.gmra.mxu0 %v3775_v26  ;;  %v1123_v26 = vsel %vm909_vm0, %v504_v28, 0 }
  0xf5   : > { %v2837_v30 = vpop.f32.mrf.mxu0 }
  0xf7   : > { %v2838_v31 = vpop.f32.mrf.mxu0 }
  0xf8   : > { %v2839_v36 = vadd.f32 %v2838_v31, %v2837_v30 }
  0xf9   : > { %v2840_v32 = vpop.f32.mrf.mxu0 }
  0xfb   : > { %v2841_v34 = vpop.f32.mrf.mxu0 }
  0xfc   : > { %v2842_v37 = vadd.f32 %v2841_v34, %v2840_v32 }
  0xfd   : > { %v2843_v38 = vpop.f32.mrf.mxu0 }
  0xfe   : > { %v844_v40 = vpack.c.bf16 %v2842_v37, %v2839_v36 }
  0xff   : > { %v2844_v42 = vpop.f32.mrf.mxu0 }
 0x100   : > { %3143 = vmatprep.mubr.msk.bf16.mxu1 %vm860_vm1, %v844_v40  ;;  %v2845_v47 = vadd.f32 %v2844_v42, %v2843_v38 }
 0x101   : > { %v2846_v43 = vpop.f32.mrf.mxu0 }
 0x103   : > { %v2847_v44 = vpop.f32.mrf.mxu0 }
 0x104   : > { %v2848_v48 = vadd.f32 %v2847_v44, %v2846_v43 }
 0x105   : > { %v2849_v12 = vpop.f32.mrf.mxu0 }
 0x106   : > { %v845_v13 = vpack.c.bf16 %v2848_v48, %v2845_v47 }
 0x107   : > { %v2850_v25 = vpop.f32.mrf.mxu0 }
 0x108   : > { %3144 = vmatmul.mubr.msk.bf16.vlgmr.msra.gmra.mxu1 %vm860_vm1, %v845_v13  ;;  %v2851_v31 = vadd.f32 %v2850_v25, %v2849_v12 }
 0x109   : > { %v2852_v24 = vpop.f32.mrf.mxu0  ;;  %3176 = vmatpush3.bf16.msra.mxu1 %v1123_v26 }
 0x10b   : > { %v2853_v30 = vpop.f32.mrf.mxu0 }
 0x10c   : > { %v2854_v32 = vadd.f32 %v2853_v30, %v2852_v24 }
 0x10d   : > { %v2855_v34 = vpop.f32.mrf.mxu0 }
 0x10e   : > { %v846_v36 = vpack.c.bf16 %v2854_v32, %v2851_v31 }
 0x10f   : > { %v2856_v37 = vpop.f32.mrf.mxu0 }
 0x110   : > { %3147 = vmatprep.mubr.msk.bf16.mxu1 %vm860_vm1, %v846_v36  ;;  %v2857_v42 = vadd.f32 %v2856_v37, %v2855_v34 }
 0x111   : > { %v2858_v40 = vpop.f32.mrf.mxu0 }
 0x113   : > { %v2859_v38 = vpop.f32.mrf.mxu0 }
 0x114   : > { %v2860_v43 = vadd.f32 %v2859_v38, %v2858_v40 }
 0x115   : > { %v2861_v44 = vpop.f32.mrf.mxu0 }
 0x116   : > { %v847_v47 = vpack.c.bf16 %v2860_v43, %v2857_v42 }
 0x117   : > { %v2862_v28 = vpop.f32.mrf.mxu0 }
 0x118   : > { %3148 = vmatmul.mubr.msk.bf16.gmra.mxu1 %vm860_vm1, %v847_v47  ;;  %v2863_v26 = vadd.f32 %v2862_v28, %v2861_v44 }
 0x119   : > { %v2864_v48 = vpop.f32.mrf.mxu0 }
 0x11b   : > { %v2865_v13 = vpop.f32.mrf.mxu0 }
 0x11c   : > { %v2866_v23 = vadd.f32 %v2865_v13, %v2864_v48 }
 0x11d   : > { %v2867_v25 = vpop.f32.mrf.mxu0 }
 0x11e   : > { %v848_v24 = vpack.c.bf16 %v2866_v23, %v2863_v26 }
 0x11f   : > { %v2868_v12 = vpop.f32.mrf.mxu0 }
 0x120   : > { %3151 = vmatprep.mubr.msk.bf16.mxu1 %vm860_vm1, %v848_v24  ;;  %v2869_v32 = vadd.f32 %v2868_v12, %v2867_v25 }
 0x121   : > { %v2870_v30 = vpop.f32.mrf.mxu0 }
 0x123   : > { %v2871_v31 = vpop.f32.mrf.mxu0 }
 0x124   : > { %v2872_v36 = vadd.f32 %v2871_v31, %v2870_v30 }
 0x125   : > { %v2873_v34 = vpop.f32.mrf.mxu0 }
 0x126   : > { %v849_v37 = vpack.c.bf16 %v2872_v36, %v2869_v32 }
 0x127   : > { %v2874_v40 = vpop.f32.mrf.mxu0 }
 0x128   : > { %3152 = vmatmul.mubr.msk.bf16.gmra.mxu1 %vm860_vm1, %v849_v37  ;;  %v2875_v43 = vadd.f32 %v2874_v40, %v2873_v34 }
 0x129   : > { %v2876_v38 = vpop.f32.mrf.mxu0 }
 0x12b   : > { %v2877_v42 = vpop.f32.mrf.mxu0 }
 0x12c   : > { %v2878_v47 = vadd.f32 %v2877_v42, %v2876_v38 }
 0x12d   : > { %v2879_v44 = vpop.f32.mrf.mxu0 }
 0x12e   : > { %v850_v28 = vpack.c.bf16 %v2878_v47, %v2875_v43 }
 0x12f   : > { %v2880_v48 = vpop.f32.mrf.mxu0 }
 0x130   : > { %3155 = vmatprep.mubr.msk.bf16.mxu1 %vm860_vm1, %v850_v28  ;;  %v2881_v26 = vadd.f32 %v2880_v48, %v2879_v44 }
 0x131   : > { %v2882_v23 = vpop.f32.mrf.mxu0 }
 0x133   : > { %v2883_v13 = vpop.f32.mrf.mxu0 }
 0x134   : > { %v2884_v24 = vadd.f32 %v2883_v13, %v2882_v23 }
 0x135   : > { %v2885_v25 = vpop.f32.mrf.mxu0 }
 0x136   : > { %v851_v12 = vpack.c.bf16 %v2884_v24, %v2881_v26 }
 0x137   : > { %v2886_v30 = vpop.f32.mrf.mxu0 }
 0x138   : > { %3156 = vmatmul.mubr.msk.bf16.gmra.mxu1 %vm860_vm1, %v851_v12  ;;  %v2887_v36 = vadd.f32 %v2886_v30, %v2885_v25 }
 0x139   : > { %v2888_v31 = vpop.f32.mrf.mxu0 }
 0x13b   : > { %v2889_v32 = vpop.f32.mrf.mxu0 }
 0x13c   : > { %v2890_v37 = vadd.f32 %v2889_v32, %v2888_v31 }
 0x13d   : > { %v2891_v34 = vpop.f32.mrf.mxu0 }
 0x13e   : > { %v852_v40 = vpack.c.bf16 %v2890_v37, %v2887_v36 }
 0x13f   : > { %v2892_v38 = vpop.f32.mrf.mxu0 }
 0x140   : > { %3159 = vmatprep.mubr.msk.bf16.mxu1 %vm860_vm1, %v852_v40  ;;  %v2893_v47 = vadd.f32 %v2892_v38, %v2891_v34 }
 0x141   : > { %v2894_v42 = vpop.f32.mrf.mxu0 }
 0x143   : > { %v2895_v43 = vpop.f32.mrf.mxu0 }
 0x144   : > { %v2896_v28 = vadd.f32 %v2895_v43, %v2894_v42 }
 0x145   : > { %v2897_v44 = vpop.f32.mrf.mxu0 }
 0x146   : > { %v853_v48 = vpack.c.bf16 %v2896_v28, %v2893_v47 }
 0x147   : > { %v2898_v23 = vpop.f32.mrf.mxu0 }
 0x148   : > { %3160 = vmatmul.mubr.msk.bf16.gmra.mxu1 %vm860_vm1, %v853_v48  ;;  %v2899_v24 = vadd.f32 %v2898_v23, %v2897_v44 }
 0x149   : > { %v2900_v13 = vpop.f32.mrf.mxu0 }
 0x14b   : > { %v2901_v26 = vpop.f32.mrf.mxu0 }
 0x14c   : > { %v2902_v12 = vadd.f32 %v2901_v26, %v2900_v13 }
 0x14d   : > { %v2903_v25 = vpop.f32.mrf.mxu0 }
 0x14e   : > { %v854_v30 = vpack.c.bf16 %v2902_v12, %v2899_v24 }
 0x14f   : > { %v2904_v31 = vpop.f32.mrf.mxu0 }
 0x150   : > { %3163 = vmatprep.mubr.msk.bf16.mxu1 %vm860_vm1, %v854_v30  ;;  %v2905_v37 = vadd.f32 %v2904_v31, %v2903_v25 }
 0x151   : > { %v2906_v32 = vpop.f32.mrf.mxu0 }
 0x153   : > { %v2907_v36 = vpop.f32.mrf.mxu0 }
 0x154   : > { %v2908_v40 = vadd.f32 %v2907_v36, %v2906_v32 }
 0x155   : > { %v2909_v34 = vpop.f32.mrf.mxu0 }
 0x156   : > { %v855_v38 = vpack.c.bf16 %v2908_v40, %v2905_v37 }
 0x157   : > { %v2910_v42 = vpop.f32.mrf.mxu0 }
 0x158   : > { %3164 = vmatmul.mubr.msk.bf16.gmra.mxu1 %vm860_vm1, %v855_v38  ;;  %v2911_v28 = vadd.f32 %v2910_v42, %v2909_v34 }
 0x159   : > { %v2912_v43 = vpop.f32.mrf.mxu0 }
 0x15b   : > { %v2913_v47 = vpop.f32.mrf.mxu0 }
 0x15c   : > { %v2914_v48 = vadd.f32 %v2913_v47, %v2912_v43 }
 0x15d   : > { %v2915_v44 = vpop.f32.mrf.mxu0 }
 0x15e   : > { %v856_v23 = vpack.c.bf16 %v2914_v48, %v2911_v28 }
 0x15f   : > { %v2916_v13 = vpop.f32.mrf.mxu0 }
 0x160   : > { %3167 = vmatprep.mubr.msk.bf16.mxu1 %vm860_vm1, %v856_v23  ;;  %v2917_v12 = vadd.f32 %v2916_v13, %v2915_v44 }
 0x161   : > { %v2918_v26 = vpop.f32.mrf.mxu0 }
 0x163   : > { %v2919_v24 = vpop.f32.mrf.mxu0 }
 0x164   : > { %v2920_v30 = vadd.f32 %v2919_v24, %v2918_v26 }
 0x165   : > { %v2921_v25 = vpop.f32.mrf.mxu0 }
 0x166   : > { %v857_v31 = vpack.c.bf16 %v2920_v30, %v2917_v12 }
 0x167   : > { %v2922_v32 = vpop.f32.mrf.mxu0 }
 0x168   : > { %3168 = vmatmul.mubr.msk.bf16.gmra.mxu1 %vm860_vm1, %v857_v31  ;;  %v2923_v40 = vadd.f32 %v2922_v32, %v2921_v25 }
 0x169   : > { %v2924_v36 = vpop.f32.mrf.mxu0 }
 0x16b   : > { %v2925_v37 = vpop.f32.mrf.mxu0 }
 0x16c   : > { %v2926_v38 = vadd.f32 %v2925_v37, %v2924_v36 }
 0x16d   : > { %v2927_v34 = vpop.f32.mrf.mxu0 }
 0x16e   : > { %v858_v42 = vpack.c.bf16 %v2926_v38, %v2923_v40 }
 0x16f   : > { %v2928_v43 = vpop.f32.mrf.mxu0 }
 0x170   : > { %3171 = vmatprep.mubr.msk.bf16.mxu1 %vm860_vm1, %v858_v42  ;;  %v2929_v48 = vadd.f32 %v2928_v43, %v2927_v34 }
 0x171   : > { %v2930_v47 = vpop.f32.mrf.mxu0 }
 0x173   : > { %v2931_v28 = vpop.f32.mrf.mxu0 }
 0x174   : > { %v2932_v23 = vadd.f32 %v2931_v28, %v2930_v47  ;;  %v3887_v47 = vld [vmem:[%s4845_s3] ss:$0 sm:$0xff] }
 0x176   : > { %v859_v44 = vpack.c.bf16 %v2932_v23, %v2929_v48 }
 0x178   : > { %3172 = vmatmul.mubr.msk.bf16.gmra.mxu1 %vm860_vm1, %v859_v44 }
 0x179   : > { %3177 = vmatprep.mubr.msk.bf16.mxu1 %vm860_vm1, %v3583_v49 }
 0x180   : > { %3178 = vmatmul.mubr.msk.bf16.vlgmr.msra.gmra.mxu1 %vm860_vm1, %v3575_v45 }
 0x181   : > { %3181 = vmatprep.mubr.msk.bf16.mxu1 %vm860_vm1, %v3565_v39 }
 0x188   : > { %3182 = vmatmul.mubr.msk.bf16.gmra.mxu1 %vm860_vm1, %v3555_v33 }
 0x189   : > { %3185 = vmatprep.mubr.msk.bf16.mxu1 %vm860_vm1, %v3545_v27 }
 0x190   : > { %3186 = vmatmul.mubr.msk.bf16.gmra.mxu1 %vm860_vm1, %v3535_v21 }
 0x191   : > { %3189 = vmatprep.mubr.msk.bf16.mxu1 %vm860_vm1, %v3525_v15 }
 0x198   : > { %3190 = vmatmul.mubr.msk.bf16.gmra.mxu1 %vm860_vm1, %v3515_v9 }
 0x199   : > { %3193 = vmatprep.mubr.msk.bf16.mxu1 %vm860_vm1, %v3578_v46 }
 0x1a0   : > { %3194 = vmatmul.mubr.msk.bf16.gmra.mxu1 %vm860_vm1, %v3569_v41 }
 0x1a1   : > { %3197 = vmatprep.mubr.msk.bf16.mxu1 %vm860_vm1, %v3559_v35 }
 0x1a8   : > { %3198 = vmatmul.mubr.msk.bf16.gmra.mxu1 %vm860_vm1, %v3549_v29 }
 0x1a9   : > { %3201 = vmatprep.mubr.msk.bf16.mxu1 %vm860_vm1, %v3538_v22 }
 0x1b0   : > { %3202 = vmatmul.mubr.msk.bf16.gmra.mxu1 %vm860_vm1, %v3528_v16 }
 0x1b1   : > { %3205 = vmatprep.mubr.msk.bf16.mxu1 %vm860_vm1, %v3517_v10 }
 0x1b8   : > { %3206 = vmatmul.mubr.msk.bf16.gmra.mxu1 %vm860_vm1, %v3510_v5 }
 0x1b9   : > { %1549 = vmatprep.mubr.bf16.mxu1 %v3496_v1 }
 0x1c8   : > { %v3145_v9 = vpop.f32.mrf.mxu1 }
 0x1ca   : > { %v947_v15 = vpop.f32.mrf.mxu1 }
 0x1cc   : > { %v3146_v21 = vpop.f32.mrf.mxu1 }
 0x1ce   : > { %v950_v27 = vpop.f32.mrf.mxu1 }
 0x1d8   : > { %v3149_v33 = vpop.f32.mrf.mxu1 }
 0x1da   : > { %v963_v29 = vpop.f32.mrf.mxu1 }
 0x1dc   : > { %v3832_v35 = vpop.f32.mrf.mxu1 }
 0x1de   : > { %v3834_v22 = vpop.f32.mrf.mxu1 }
 0x1e8   : > { %v3836_v39 = vpop.f32.mrf.mxu1 }
 0x1ea   : > { %v3838_v16 = vpop.f32.mrf.mxu1 }
 0x1ec   : > { %v3840_v10 = vpop.f32.mrf.mxu1 }
 0x1ee   : > { %v3842_v41 = vpop.f32.mrf.mxu1 }
 0x1f8   : > { %v3844_v5 = vpop.f32.mrf.mxu1 }
 0x1fa   : > { %v3846_v1 = vpop.f32.mrf.mxu1 }
 0x1fc   : > { %v3848_v45 = vpop.f32.mrf.mxu1 }
 0x1fe   : > { %v3850_v46 = vpop.f32.mrf.mxu1 }
 0x208   : > { %v3852_v49 = vpop.f32.mrf.mxu1 }
 0x20a   : > { %v3854_v13 = vpop.f32.mrf.mxu1 }
 0x20c   : > { %v3856_v26 = vpop.f32.mrf.mxu1 }
 0x20e   : > { %v3858_v24 = vpop.f32.mrf.mxu1 }
 0x218   : > { %v3860_v12 = vpop.f32.mrf.mxu1 }
 0x21a   : > { %v3862_v30 = vpop.f32.mrf.mxu1 }
 0x21c   : > { %v3864_v25 = vpop.f32.mrf.mxu1 }
 0x21e   : > { %v3866_v31 = vpop.f32.mrf.mxu1 }
 0x228   : > { %v3868_v32 = vpop.f32.mrf.mxu1 }
 0x22a   : > { %v3870_v36 = vpop.f32.mrf.mxu1 }
 0x22c   : > { %v3872_v37 = vpop.f32.mrf.mxu1 }
 0x22e   : > { %v3874_v40 = vpop.f32.mrf.mxu1 }
 0x238   : > { %v3876_v38 = vpop.f32.mrf.mxu1 }
 0x23a   : > { %v3878_v34 = vpop.f32.mrf.mxu1 }
 0x23c   : > { %v3880_v42 = vpop.f32.mrf.mxu1 }
 0x23e   : > { %v3882_v43 = vpop.f32.mrf.mxu1 }
 0x240   : > { %v3179_v28 = vpop.f32.mrf.mxu1 }
 0x241   : > { %v1168_v48 = vadd.f32 %v3179_v28, %v3145_v9 }
 0x242   : > { %v1159_v23 = vpop.f32.mrf.mxu1 }
 0x243   : > { %v1294_v44 = vadd.f32 %v3887_v47, %v1168_v48  ;;  %v1160_v20 = vadd.f32 %v1159_v23, %v947_v15 }
 0x244   : > { %v3180_v19 = vpop.f32.mrf.mxu1 }
 0x245   : > { %v1326_v17 = vmax.f32 %v1294_v44, 0.0  ;;  %v1292_v14 = vadd.f32 %v3887_v47, %v1160_v20  ;;  %v1171_v11 = vadd.f32 %v3180_v19, %v3146_v21 }
 0x246   : > { %v1162_v8 = vpop.f32.mrf.mxu1 }
 0x247   : > { %v1324_v7 = vmax.f32 %v1292_v14, 0.0  ;;  %v1295_v6 = vadd.f32 %v3887_v47, %v1171_v11  ;;  %v1163_v9 = vadd.f32 %v1162_v8, %v950_v27  ;;  %v1365_v28 = vmul.f32 %v3893_v18, %v1326_v17 }
 0x248   : > { %v3183_v48 = vpop.f32.mrf.mxu1 }
 0x249   : > { %v1327_v15 = vmax.f32 %v1295_v6, 0.0  ;;  %v1293_v23 = vadd.f32 %v3887_v47, %v1163_v9  ;;  %v1184_v4 = vadd.f32 %v3183_v48, %v3149_v33  ;;  %v1402_v3 = vsel %vm1395_vm2, %v1365_v28, 0.0 }
 0x24a   : > { %1403 = vadd.xlane.f32.xlu0 %v1402_v3  ;;  %v1175_v44 = vpop.f32.mrf.mxu1  ;;  %v1363_v20 = vmul.f32 %v3893_v18, %v1324_v7 }
 0x24b   : > { %v3901_v19 = vpack.c.bf16 %v1327_v15, %v1326_v17  ;;  %v1325_v21 = vmax.f32 %v1293_v23, 0.0  ;;  %v1176_v14 = vadd.f32 %v1175_v44, %v963_v29  ;;  %v3906_v8 = vadd.f32 %v3887_v47, %v1184_v4 }
 0x24c   : > { %v3184_v2 = vpop.f32.mrf.mxu1  ;;  %v1396_v6 = vsel %vm1395_vm2, %v1363_v20, 0.0  ;;  %v1366_v27 = vmul.f32 %v3893_v18, %v1327_v15 }
 0x24d   : > { %v3903_v11 = vpack.c.bf16 %v1325_v21, %v1324_v7  ;;  %v3911_v3 = vadd.f32 %v3887_v47, %v1176_v14  ;;  %v4873_v17 = vmax.f32 %v3906_v8, 0.0  ;;  %v1187_v29 = vadd.f32 %v3184_v2, %v3832_v35 }
 0x24e   : > { %v1178_v33 = vpop.f32.mrf.mxu1  ;;  %1397 = vadd.xlane.f32.xlu0 %v1396_v6  ;;  %v1405_v7 = vsel %vm1395_vm2, %v1366_v27, 0.0  ;;  %v1364_v28 = vmul.f32 %v3893_v18, %v1325_v21 }
 0x24f   : > { %v4872_v48 = vmax.f32 %v3911_v3, 0.0  ;;  %v3919_v15 = vadd.f32 %v3887_v47, %v1187_v29  ;;  %v1179_v44 = vadd.f32 %v1178_v33, %v3834_v22  ;;  %v1369_v2 = vmul.f32 %v3893_v18, %v4873_v17 }
 0x250   : > { %v3187_v9 = vpop.f32.mrf.mxu1  ;;  %v1399_v20 = vsel %vm1395_vm2, %v1364_v28, 0.0 }
 0x251   : > { %v1200_v21 = vadd.f32 %v3187_v9, %v3836_v39  ;;  %v4874_v6 = vmax.f32 %v3919_v15, 0.0  ;;  %v3929_v27 = vadd.f32 %v3887_v47, %v1179_v44  ;;  %v1414_v29 = vsel %vm1395_vm2, %v1369_v2, 0.0 }
 0x252   : > { %v1191_v4 = vpop.f32.mrf.mxu1  ;;  %1406 = vadd.xlane.f32.xlu0 %v1405_v7  ;;  %v1367_v22 = vmul.f32 %v3893_v18, %v4872_v48 }
 0x253   : > { %v3936_v7 = vadd.f32 %v3887_v47, %v1200_v21  ;;  %v1192_v28 = vadd.f32 %v1191_v4, %v3838_v16  ;;  %v4875_v9 = vmax.f32 %v3929_v27, 0.0 }
 0x254   : > { %v3188_v23 = vpop.f32.mrf.mxu1  ;;  %v1408_v44 = vsel %vm1395_vm2, %v1367_v22, 0.0 }
 0x255   : > { %v3950_v21 = vadd.f32 %v3887_v47, %v1192_v28  ;;  %v1203_v16 = vadd.f32 %v3188_v23, %v3840_v10  ;;  %v1368_v22 = vmul.f32 %v3893_v18, %v4875_v9 }
 0x256   : > { %v1194_v35 = vpop.f32.mrf.mxu1  ;;  %1400 = vadd.xlane.f32.xlu0 %v1399_v20  ;;  %v1370_v20 = vmul.f32 %v3893_v18, %v4874_v6 }
 0x257   : > { %v4877_v28 = vmax.f32 %v3950_v21, 0.0  ;;  %v3964_v10 = vadd.f32 %v3887_v47, %v1203_v16 }
 0x258   : > { %v3191_v14 = vpop.f32.mrf.mxu1  ;;  %v1417_v17 = vsel %vm1395_vm2, %v1370_v20, 0.0  ;;  %v4911_v20 = vmax.f32 %v3936_v7, 0.0 }
 0x25a   : > { %v1207_v33 = vpop.f32.mrf.mxu1  ;;  %1415 = vadd.xlane.f32.xlu0 %v1414_v29 }
 0x25c   : > { %v3939_v39 = vpop.f32.mrf.mxu1 }
 0x25e   : > { %v3946_v2 = vpop.f32.mrf.mxu1  ;;  %1409 = vadd.xlane.f32.xlu0 %v1408_v44 }
 0x260   : > { %v3195_v4 = vpop.f32.mrf.mxu1 }
 0x261   : > { %v1232_v48 = vadd.f32 %v3195_v4, %v3852_v49  ;;  %v1195_v49 = vadd.f32 %v1194_v35, %v3842_v41  ;;  %v1373_v4 = vmul.f32 %v3893_v18, %v4911_v20 }
 0x262   : > { %v1223_v6 = vpop.f32.mrf.mxu1  ;;  %1418 = vadd.xlane.f32.xlu0 %v1417_v17 }
 0x263   : > { %v3959_v44 = vadd.f32 %v3887_v47, %v1232_v48  ;;  %v1224_v29 = vadd.f32 %v1223_v6, %v3854_v13  ;;  %v1411_v13 = vsel %vm1395_vm2, %v1368_v22, 0.0  ;;  %v1216_v22 = vadd.f32 %v3191_v14, %v3844_v5 }
 0x264   : > { %v3196_v23 = vpop.f32.mrf.mxu1 }
 0x265   : > { %v4876_v9 = vmax.f32 %v3959_v44, 0.0  ;;  %v3972_v17 = vadd.f32 %v3887_v47, %v1224_v29  ;;  %v1235_v48 = vadd.f32 %v3196_v23, %v3856_v26  ;;  %v4879_v29 = vmax.f32 %v3964_v10, 0.0 }
 0x266   : > { %v1226_v6 = vpop.f32.mrf.mxu1  ;;  %1412 = vadd.xlane.f32.xlu0 %v1411_v13  ;;  %v3988_v26 = vadd.f32 %v3887_v47, %v1195_v49  ;;  %v1426_v13 = vsel %vm1395_vm2, %v1373_v4, 0.0 }
 0x267   : > { %v3978_v41 = vadd.f32 %v3887_v47, %v1235_v48  ;;  %v1227_v35 = vadd.f32 %v1226_v6, %v3858_v24  ;;  %v3984_v20 = vmul.f32 %v3893_v18, %v4876_v9  ;;  %v1371_v6 = vmul.f32 %v3893_v18, %v4877_v28 }
 0x268   : > { %v3199_v23 = vpop.f32.mrf.mxu1  ;;  %v1208_v9 = vadd.f32 %v1207_v33, %v3846_v1  ;;  %v4912_v5 = vmax.f32 %v3972_v17, 0.0  ;;  %v4018_v33 = vadd.f32 %v3887_v47, %v1216_v22 }
 0x269   : > { %v4878_v48 = vmax.f32 %v3978_v41, 0.0  ;;  %v3994_v16 = vadd.f32 %v3887_v47, %v1227_v35  ;;  %v1248_v24 = vadd.f32 %v3199_v23, %v3860_v12 }
 0x26a   : > { %v1239_v49 = vpop.f32.mrf.mxu1  ;;  %1427 = vadd.xlane.f32.xlu0 %v1426_v13  ;;  %v4004_v14 = vmul.f32 %v3893_v18, %v4912_v5  ;;  %v1374_v5 = vmul.f32 %v3893_v18, %v4879_v29  ;;  %v4916_v29 = vmax.f32 %v4018_v33, 0.0 }
 0x26b   : > { %v4880_v4 = vmax.f32 %v3994_v16, 0.0  ;;  %v4008_v35 = vadd.f32 %v3887_v47, %v1248_v24  ;;  %v1240_v12 = vadd.f32 %v1239_v49, %v3862_v30  ;;  %v4014_v23 = vmul.f32 %v3893_v18, %v4878_v48 }
 0x26c   : > { %v3200_v13 = vpop.f32.mrf.mxu1  ;;  %v1420_v49 = vsel %vm1395_vm2, %v1371_v6, 0.0  ;;  %v4030_v48 = vadd.f32 %v3887_v47, %v1208_v9 }
 0x26d   : > { %v4025_v28 = vadd.f32 %v3887_v47, %v1240_v12  ;;  %v1251_v30 = vadd.f32 %v3200_v13, %v3864_v25  ;;  %v4035_v22 = vmul.f32 %v3893_v18, %v4880_v4  ;;  %v4913_v25 = vmax.f32 %v4008_v35, 0.0 }
 0x26e   : > { %v1242_v1 = vpop.f32.mrf.mxu1  ;;  %1421 = vadd.xlane.f32.xlu0 %v1420_v49  ;;  %v1219_v13 = vadd.f32 %v3939_v39, %v3848_v45  ;;  %v1429_v4 = vsel %vm1395_vm2, %v1374_v5, 0.0 }
 0x26f   : > { %v4039_v24 = vadd.f32 %v3887_v47, %v1251_v30  ;;  %v1243_v12 = vadd.f32 %v1242_v1, %v3866_v31  ;;  %v4045_v6 = vmul.f32 %v3893_v18, %v4913_v25  ;;  %v4914_v1 = vmax.f32 %v3988_v26, 0.0 }
 0x270   : > { %v3203_v49 = vpop.f32.mrf.mxu1  ;;  %v4915_v9 = vmax.f32 %v4025_v28, 0.0 }
 0x271   : > { %v4053_v30 = vadd.f32 %v3887_v47, %v1243_v12  ;;  %v1264_v31 = vadd.f32 %v3203_v49, %v3868_v32  ;;  %v1372_v25 = vmul.f32 %v3893_v18, %v4914_v1  ;;  %v1307_v49 = vadd.f32 %v3887_v47, %v1219_v13 }
 0x272   : > { %v1255_v0 = vpop.f32.mrf.mxu1  ;;  %1430 = vadd.xlane.f32.xlu0 %v1429_v4  ;;  %v4062_v45 = vmul.f32 %v3893_v18, %v4915_v9  ;;  %v1211_v1 = vadd.f32 %v3946_v2, %v3850_v46  ;;  %v1377_v9 = vmul.f32 %v3893_v18, %v4916_v29  ;;  %v4917_v63 = vmax.f32 %v4039_v24, 0.0 }
 0x273   : > { %v4067_v12 = vadd.f32 %v3887_v47, %v1264_v31  ;;  %v1256_v32 = vadd.f32 %v1255_v0, %v3870_v36  ;;  %v1423_v36 = vsel %vm1395_vm2, %v1372_v25, 0.0  ;;  %v4918_v46 = vmax.f32 %v4053_v30, 0.0 }
 0x274   : > { %v3204_v4 = vpop.f32.mrf.mxu1  ;;  %v4079_v39 = vmul.f32 %v3893_v18, %v4917_v63  ;;  %v4919_v25 = vmax.f32 %v4030_v48, 0.0 }
 0x275   : > { %v1350_v31 = vmax.f32 %v4067_v12, 0.0  ;;  %v1316_v5 = vadd.f32 %v3887_v47, %v1256_v32  ;;  %v1267_v0 = vadd.f32 %v3204_v4, %v3872_v37  ;;  %v4088_v2 = vmul.f32 %v3893_v18, %v4918_v46 }
 0x276   : > { %v1258_v13 = vpop.f32.mrf.mxu1  ;;  %1424 = vadd.xlane.f32.xlu0 %v1423_v36  ;;  %v1339_v32 = vmax.f32 %v1307_v49, 0.0  ;;  %v1305_v37 = vadd.f32 %v3887_v47, %v1211_v1  ;;  %v1375_v36 = vmul.f32 %v3893_v18, %v4919_v25 }
 0x277   : > { %v1348_v29 = vmax.f32 %v1316_v5, 0.0  ;;  %v1319_v62 = vadd.f32 %v3887_v47, %v1267_v0  ;;  %v1259_v63 = vadd.f32 %v1258_v13, %v3874_v40  ;;  %v4093_v12 = vmul.f32 %v3893_v18, %v1350_v31 }
 0x278   : > { %v3207_v4 = vpop.f32.mrf.mxu1  ;;  %v1438_v0 = vsel %vm1395_vm2, %v1377_v9, 0.0  ;;  %v1337_v59 = vmax.f32 %v1305_v37, 0.0 }
 0x279   : > { %v1351_v61 = vmax.f32 %v1319_v62, 0.0  ;;  %v1317_v46 = vadd.f32 %v3887_v47, %v1259_v63  ;;  %v1280_v5 = vadd.f32 %v3207_v4, %v3876_v38  ;;  %v4103_v40 = vmul.f32 %v3893_v18, %v1348_v29 }
 0x27a   : > { %v1271_v60 = vpop.f32.mrf.mxu1  ;;  %1439 = vadd.xlane.f32.xlu0 %v1438_v0  ;;  %v1432_v62 = vsel %vm1395_vm2, %v1375_v36, 0.0  ;;  %v1378_v63 = vmul.f32 %v3893_v18, %v1339_v32 }
 0x27b   : > { %v1349_v49 = vmax.f32 %v1317_v46, 0.0  ;;  %v1322_v1 = vadd.f32 %v3887_v47, %v1280_v5  ;;  %v1272_v13 = vadd.f32 %v1271_v60, %v3878_v34  ;;  %v4110_v38 = vmul.f32 %v3893_v18, %v1351_v61 }
 0x27c   : > { %v3208_v58 = vpop.f32.mrf.mxu1 }
 0x27d   : > { %v1354_v9 = vmax.f32 %v1322_v1, 0.0  ;;  %v1320_v4 = vadd.f32 %v3887_v47, %v1272_v13  ;;  %v1283_v25 = vadd.f32 %v3208_v58, %v3880_v42  ;;  %v4114_v0 = vpack.c.bf16 %v1349_v49, %v1348_v29 }
 0x27e   : > { %v1274_v46 = vpop.f32.mrf.mxu1  ;;  %1433 = vadd.xlane.f32.xlu0 %v1432_v62  ;;  %v4117_v60 = vmul.f32 %v3893_v18, %v1349_v49  ;;  %v1441_v1 = vsel %vm1395_vm2, %v1378_v63, 0.0  ;;  %v1376_v42 = vmul.f32 %v3893_v18, %v1337_v59 }
 0x27f   : > { %v1352_v34 = vmax.f32 %v1320_v4, 0.0  ;;  %v1323_v37 = vadd.f32 %v3887_v47, %v1283_v25  ;;  %v1275_v36 = vadd.f32 %v1274_v46, %v3882_v43  ;;  %v4122_v5 = vmul.f32 %v3893_v18, %v1354_v9 }
 0x280   : > { %v4920_v43 = vmax.f32 %v4018_v33, 0.0  ;;  %v1450_v33 = vsel %vm1395_vm2, %v3984_v20, 0.0  ;;  %v4925_v20 = vmax.f32 %v3988_v26, 0.0  ;;  %v4929_v26 = vmax.f32 %v3919_v15, 0.0 }
 0x281   : > { %v1355_v13 = vmax.f32 %v1323_v37, 0.0  ;;  %v1321_v58 = vadd.f32 %v3887_v47, %v1275_v36  ;;  %v4128_v29 = vmul.f32 %v3893_v18, %v1352_v34  ;;  %v1435_v47 = vsel %vm1395_vm2, %v1376_v42, 0.0 }
 0x282   : > { %1442 = vadd.xlane.f32.xlu0 %v1441_v1  ;;  %v4137_v25 = vpack.c.bf16 %v1339_v32, %v4920_v43  ;;  %v4154_v32 = vpack.c.bf16 %v1351_v61, %v1350_v31  ;;  %v4924_v61 = vmax.f32 %v3950_v21, 0.0  ;;  %v4927_v31 = vmax.f32 %v4039_v24, 0.0 }
 0x283   : > { %v1353_v49 = vmax.f32 %v1321_v58, 0.0  ;;  %v4130_v62 = vpack.c.bf16 %v1355_v13, %v1354_v9  ;;  %v4133_v4 = vmul.f32 %v3893_v18, %v1355_v13  ;;  %v4921_v9 = vmax.f32 %v4030_v48, 0.0 }
 0x284   : > { %v4172_v48 = vpack.c.bf16 %v4925_v20, %v4924_v61  ;;  %v4928_v21 = vmax.f32 %v3906_v8, 0.0  ;;  %v4931_v24 = vmax.f32 %v4053_v30, 0.0  ;;  %v4932_v8 = vmax.f32 %v3911_v3, 0.0  ;;  %v4956_v61 = vld [vmem:[#allocation21_spill] sm:$0xff]  ;;  %v4957_v20 = vld [vmem:[#allocation22_spill] sm:$0xff] }
 0x285   : > { %2967 = vmatprep.subr.bf16.mxu1 %v4130_v62  ;;  %v4141_v63 = vpack.c.bf16 %v1353_v49, %v1352_v34  ;;  %v4144_v46 = vmul.f32 %v3893_v18, %v1353_v49  ;;  %v4150_v37 = vpack.c.bf16 %v1337_v59, %v4921_v9  ;;  %v4922_v18 = vmax.f32 %v3936_v7, 0.0  ;;  %v4951_v9 = vld [vmem:[#allocation16_spill] sm:$0xff] }
 0x286   : > { %2968 = vmatpush3.bf16.msra.mxu1 %v4137_v25  ;;  %1436 = vadd.xlane.f32.xlu0 %v1435_v47  ;;  %v4923_v34 = vmax.f32 %v3964_v10, 0.0  ;;  %v1444_v59 = vsel %vm1395_vm2, %v4004_v14, 0.0  ;;  %v1453_v7 = vsel %vm1395_vm2, %v4014_v23, 0.0  ;;  %v4926_v10 = vmax.f32 %v4008_v35, 0.0  ;;  %v3398_v47 = vld [vmem:[%s4846_s4 + $0x10] sm:$0xff]  }
 0x287   : > { %2969 = vmatprep.subr.bf16.mxu1 %v4141_v63  ;;  %v4188_v14 = vpack.c.bf16 %v4929_v26, %v4928_v21  ;;  %v1447_v23 = vsel %vm1395_vm2, %v4035_v22, 0.0  ;;  %v4930_v35 = vmax.f32 %v4025_v28, 0.0  ;;  %v4933_v15 = vmax.f32 %v3929_v27, 0.0  ;;  %v3399_v21 = vld [vmem:[%s4846_s4 + $0x8] sm:$0xff]  }
 0x288   : > { %v4162_v36 = vpack.c.bf16 %v4923_v34, %v4922_v18  ;;  %v4180_v1 = vpack.c.bf16 %v4927_v31, %v4926_v10  ;;  %v1462_v22 = vsel %vm1395_vm2, %v4045_v6, 0.0  ;;  %v4934_v28 = vmax.f32 %v3959_v44, 0.0  ;;  %v4938_v6 = vld [vmem:[#allocation3_spill] sm:$0xff]  ;;  %v4953_v18 = vld [vmem:[#allocation18_spill] sm:$0xff]  ;;  %v4959_v10 = vld [vmem:[#allocation24_spill] sm:$0xff] }
 0x289   : > { %v4196_v13 = vpack.c.bf16 %v4931_v24, %v4930_v35  ;;  %v4204_v58 = vpack.c.bf16 %v4933_v15, %v4932_v8  ;;  %v4935_v30 = vmax.f32 %v3978_v41, 0.0  ;;  %v1456_v3 = vsel %vm1395_vm2, %v4062_v45, 0.0  ;;  %v4939_v45 = vld [vmem:[#allocation4_spill] sm:$0xff]  ;;  %v4954_v34 = vld [vmem:[#allocation19_spill] sm:$0xff]  ;;  %v4960_v31 = vld [vmem:[#allocation25_spill] sm:$0xff] }
 0x28a   : > { %2970 = vmatpush3.bf16.msra.mxu1 %v4150_v37  ;;  %1451 = vadd.xlane.f32.xlu0 %v1450_v33  ;;  %v4936_v27 = vmax.f32 %v3972_v17, 0.0  ;;  %v4937_v49 = vmax.f32 %v3994_v16, 0.0  ;;  %v1465_v44 = vsel %vm1395_vm2, %v4079_v39, 0.0  ;;  %v1459_v17 = vsel %vm1395_vm2, %v4088_v2, 0.0  ;;  %v4940_v39 = vld [vmem:[#allocation5_spill] sm:$0xff]  ;;  %v4942_v2 = vld [vmem:[#allocation7_spill] sm:$0xff] }
 0x28b   : > { %2971 = vmatprep.subr.bf16.mxu1 %v4154_v32  ;;  %v4212_v42 = vpack.c.bf16 %v4935_v30, %v4934_v28  ;;  %v1474_v16 = vsel %vm1395_vm2, %v4093_v12, 0.0  ;;  %v1468_v41 = vsel %vm1395_vm2, %v4103_v40, 0.0  ;;  %v4943_v12 = vld [vmem:[#allocation8_spill] sm:$0xff]  ;;  %v4944_v40 = vld [vmem:[#allocation9_spill] sm:$0xff] }
 0x28c   : > { %v4222_v43 = vpack.c.bf16 %v4937_v49, %v4936_v27  ;;  %v4952_v33 = vld [vmem:[#allocation17_spill] sm:$0xff] }
 0x28e   : > { %2972 = vmatpush3.bf16.msra.mxu1 %v4162_v36  ;;  %1445 = vadd.xlane.f32.xlu0 %v1444_v59  ;;  %v4955_v59 = vld [vmem:[#allocation20_spill] sm:$0xff] }
 0x28f   : > { %2973 = vmatprep.subr.bf16.mxu1 %v4114_v0 }
 0x292   : > { %2974 = vmatpush3.bf16.msra.mxu1 %v4172_v48  ;;  %1454 = vadd.xlane.f32.xlu0 %v1453_v7  ;;  %v4958_v7 = vld [vmem:[#allocation23_spill] sm:$0xff] }
 0x293   : > { %2975 = vmatprep.subr.bf16.mxu1 %v4180_v1 }
 0x296   : > { %2976 = vmatpush3.bf16.msra.mxu1 %v4188_v14  ;;  %1448 = vadd.xlane.f32.xlu0 %v1447_v23 }
 0x297   : > { %2977 = vmatprep.subr.bf16.mxu1 %v4196_v13 }
 0x29a   : > { %2978 = vmatpush3.bf16.msra.mxu1 %v4204_v58  ;;  %1463 = vadd.xlane.f32.xlu0 %v1462_v22 }
 0x29b   : > { %2979 = vmatprep.subr.bf16.mxu1 %v4212_v42 }
 0x29e   : > { %2980 = vmatpush3.bf16.msra.mxu1 %v3901_v19  ;;  %1457 = vadd.xlane.f32.xlu0 %v1456_v3 }
 0x29f   : > { %2981 = vmatprep.subr.bf16.mxu1 %v4222_v43 }
 0x2a2   : > { %2982 = vmatpush3.bf16.msra.mxu1 %v3903_v11  ;;  %1466 = vadd.xlane.f32.xlu0 %v1465_v44 }
 0x2a5   : > { %1550 = vmatmul.mubr.bf16.vlgmr.msra.gmra.mxu1 %v3589_v50  ;;  %v1477_v50 = vsel %vm1395_vm2, %v4110_v38, 0.0  ;;  %v4945_v38 = vld [vmem:[#allocation10_spill] sm:$0xff] }
 0x2a6   : > { %1460 = vadd.xlane.f32.xlu0 %v1459_v17  ;;  %1557 = vmatprep.mubr.bf16.mxu1 %v3595_v51  ;;  %v1471_v51 = vsel %vm1395_vm2, %v4117_v60, 0.0  ;;  %v4946_v60 = vld [vmem:[#allocation11_spill] sm:$0xff] }
 0x2aa   : > { %1475 = vadd.xlane.f32.xlu0 %v1474_v16 }
 0x2ad   : > { %1558 = vmatmul.mubr.bf16.gmra.mxu1 %v3602_v52  ;;  %v1486_v52 = vsel %vm1395_vm2, %v4122_v5, 0.0  ;;  %v4947_v5 = vld [vmem:[#allocation12_spill] sm:$0xff] }
 0x2ae   : > { %1469 = vadd.xlane.f32.xlu0 %v1468_v41  ;;  %1565 = vmatprep.mubr.bf16.mxu1 %v3607_v53  ;;  %v1480_v53 = vsel %vm1395_vm2, %v4128_v29, 0.0  ;;  %v4948_v29 = vld [vmem:[#allocation13_spill] sm:$0xff]  ;;  %v3400_v41 = vld [vmem:[%s4846_s4] sm:$0xff]  }
 0x2b2   : > { %1478 = vadd.xlane.f32.xlu0 %v1477_v50 }
 0x2b5   : > { %1566 = vmatmul.mubr.bf16.gmra.mxu1 %v3614_v54  ;;  %v1489_v54 = vsel %vm1395_vm2, %v4133_v4, 0.0  ;;  %v4949_v4 = vld [vmem:[#allocation14_spill] sm:$0xff] }
 0x2b6   : > { %1472 = vadd.xlane.f32.xlu0 %v1471_v51  ;;  %1573 = vmatprep.mubr.bf16.mxu1 %v3619_v55  ;;  %v1483_v55 = vsel %vm1395_vm2, %v4144_v46, 0.0  ;;  %v4950_v46 = vld [vmem:[#allocation15_spill] sm:$0xff] }
 0x2ba   : > { %1487 = vadd.xlane.f32.xlu0 %v1486_v52 }
 0x2bd   : > { %1574 = vmatmul.mubr.bf16.gmra.mxu1 %v3626_v56  ;;  %v4941_v56 = vld [vmem:[#allocation6_spill] sm:$0xff] }
 0x2be   : > { %1481 = vadd.xlane.f32.xlu0 %v1480_v53  ;;  %1581 = vmatprep.mubr.bf16.mxu1 %v3631_v57  ;;  %v3397_v57 = vld [vmem:[%s4846_s4 + $0x18] sm:$0xff]  }
 0x2bf   : > { %3209 = vmatprep.subr.bf16.mxu0 %v3397_v57 }
 0x2c0   : > { %3210 = vmatpush3.bf16.msra.mxu0 %v3397_v57 }
 0x2c1   : > { %3211 = vmatprep.subr.bf16.mxu0 %v3398_v47 }
 0x2c2   : > { %1490 = vadd.xlane.f32.xlu0 %v1489_v54 }
 0x2c4   : > { %3212 = vmatpush3.bf16.msra.mxu0 %v3398_v47 }
 0x2c5   : > { %1582 = vmatmul.mubr.bf16.gmra.mxu1 %v4938_v6  ;;  %3245 = vmatprep.subr.bf16.mxu0 %v3399_v21 }
 0x2c6   : > { %1484 = vadd.xlane.f32.xlu0 %v1483_v55  ;;  %1589 = vmatprep.mubr.bf16.mxu1 %v4939_v45 }
 0x2cd   : > { %1590 = vmatmul.mubr.bf16.gmra.mxu1 %v4940_v39 }
 0x2ce   : > { %1597 = vmatprep.mubr.bf16.mxu1 %v4941_v56 }
 0x2d5   : > { %1598 = vmatmul.mubr.bf16.gmra.mxu1 %v4942_v2 }
 0x2d6   : > { %1605 = vmatprep.mubr.bf16.mxu1 %v4943_v12 }
 0x2dd   : > { %1606 = vmatmul.mubr.bf16.gmra.mxu1 %v4944_v40 }
 0x2de   : > { %1613 = vmatprep.mubr.bf16.mxu1 %v4945_v38 }
 0x2e5   : > { %1614 = vmatmul.mubr.bf16.gmra.mxu1 %v4946_v60 }
 0x2e6   : > { %1621 = vmatprep.mubr.bf16.mxu1 %v4947_v5 }
 0x2ed   : > { %1622 = vmatmul.mubr.bf16.gmra.mxu1 %v4948_v29 }
 0x2ee   : > { %1629 = vmatprep.mubr.bf16.mxu1 %v4949_v4 }
 0x2f5   : > { %1630 = vmatmul.mubr.bf16.gmra.mxu1 %v4950_v46 }
 0x2f6   : > { %1637 = vmatprep.mubr.bf16.mxu1 %v4951_v9 }
 0x2fd   : > { %1638 = vmatmul.mubr.bf16.gmra.mxu1 %v4952_v33 }
 0x2fe   : > { %1645 = vmatprep.mubr.bf16.mxu1 %v4953_v18 }
 0x305   : > { %1646 = vmatmul.mubr.bf16.gmra.mxu1 %v4954_v34 }
 0x306   : > { %1653 = vmatprep.mubr.bf16.mxu1 %v4955_v59 }
 0x30d   : > { %1654 = vmatmul.mubr.bf16.gmra.mxu1 %v4956_v61 }
 0x30e   : > { %1661 = vmatprep.mubr.bf16.mxu1 %v4957_v20 }
 0x315   : > { %1662 = vmatmul.mubr.bf16.gmra.mxu1 %v4958_v7 }
 0x316   : > { %1669 = vmatprep.mubr.bf16.mxu1 %v4959_v10 }
 0x31d   : > { %1670 = vmatmul.mubr.bf16.gmra.mxu1 %v4960_v31 }
 0x365   : > { %v2983_v26 = vpop.f32.mrf.mxu1 }
 0x367   : > { %v2984_v23 = vpop.f32.mrf.mxu1 }
 0x368   : > { %v2985_v8 = vadd.f32 %v2984_v23, %v2983_v26 }
 0x369   : > { %v2986_v35 = vpop.f32.mrf.mxu1 }
 0x36b   : > { %v2987_v24 = vpop.f32.mrf.mxu1 }
 0x36c   : > { %v2988_v15 = vadd.f32 %v2987_v24, %v2986_v35 }
 0x36d   : > { %v2989_v22 = vpop.f32.mrf.mxu1 }
 0x36e   : > { %v1678_v28 = vpack.c.bf16 %v2988_v15, %v2985_v8 }
 0x36f   : > { %v2990_v30 = vpop.f32.mrf.mxu1 }
 0x370   : > { %3213 = vmatprep.mubr.msk.bf16.mxu0 %vm1395_vm2, %v1678_v28  ;;  %v2991_v49 = vadd.f32 %v2990_v30, %v2989_v22 }
 0x371   : > { %v2992_v3 = vpop.f32.mrf.mxu1 }
 0x373   : > { %v2993_v27 = vpop.f32.mrf.mxu1 }
 0x374   : > { %v2994_v44 = vadd.f32 %v2993_v27, %v2992_v3 }
 0x375   : > { %v2995_v17 = vpop.f32.mrf.mxu1 }
 0x376   : > { %v1679_v16 = vpack.c.bf16 %v2994_v44, %v2991_v49 }
 0x377   : > { %v2996_v50 = vpop.f32.mrf.mxu1 }
 0x378   : > { %3214 = vmatmul.mubr.msk.bf16.vlgmr.msra.gmra.mxu0 %vm1395_vm2, %v1679_v16  ;;  %v2997_v53 = vadd.f32 %v2996_v50, %v2995_v17 }
 0x379   : > { %v2998_v51 = vpop.f32.mrf.mxu1  ;;  %3246 = vmatpush3.bf16.msra.mxu0 %v3399_v21 }
 0x37a   : > { %3247 = vmatprep.subr.bf16.mxu0 %v3400_v41 }
 0x37b   : > { %v2999_v52 = vpop.f32.mrf.mxu1 }
 0x37c   : > { %v3000_v54 = vadd.f32 %v2999_v52, %v2998_v51 }
 0x37d   : > { %v3001_v6 = vpop.f32.mrf.mxu1  ;;  %3248 = vmatpush3.bf16.msra.mxu0 %v3400_v41 }
 0x37e   : > { %v1680_v55 = vpack.c.bf16 %v3000_v54, %v2997_v53 }
 0x37f   : > { %v3002_v45 = vpop.f32.mrf.mxu1 }
 0x380   : > { %3217 = vmatprep.mubr.msk.bf16.mxu0 %vm1395_vm2, %v1680_v55  ;;  %v3003_v57 = vadd.f32 %v3002_v45, %v3001_v6 }
 0x381   : > { %v3004_v39 = vpop.f32.mrf.mxu1 }
 0x383   : > { %v3005_v56 = vpop.f32.mrf.mxu1 }
 0x384   : > { %v3006_v2 = vadd.f32 %v3005_v56, %v3004_v39 }
 0x385   : > { %v3007_v12 = vpop.f32.mrf.mxu1 }
 0x386   : > { %v1681_v40 = vpack.c.bf16 %v3006_v2, %v3003_v57 }
 0x387   : > { %v3008_v38 = vpop.f32.mrf.mxu1 }
 0x388   : > { %3218 = vmatmul.mubr.msk.bf16.gmra.mxu0 %vm1395_vm2, %v1681_v40  ;;  %v3009_v29 = vadd.f32 %v3008_v38, %v3007_v12 }
 0x389   : > { %v3010_v60 = vpop.f32.mrf.mxu1 }
 0x38b   : > { %v3011_v5 = vpop.f32.mrf.mxu1 }
 0x38c   : > { %v3012_v4 = vadd.f32 %v3011_v5, %v3010_v60 }
 0x38d   : > { %v3013_v47 = vpop.f32.mrf.mxu1 }
 0x38e   : > { %v1682_v46 = vpack.c.bf16 %v3012_v4, %v3009_v29 }
 0x38f   : > { %v3014_v9 = vpop.f32.mrf.mxu1 }
 0x390   : > { %3221 = vmatprep.mubr.msk.bf16.mxu0 %vm1395_vm2, %v1682_v46  ;;  %v3015_v34 = vadd.f32 %v3014_v9, %v3013_v47 }
 0x391   : > { %v3016_v33 = vpop.f32.mrf.mxu1 }
 0x393   : > { %v3017_v18 = vpop.f32.mrf.mxu1 }
 0x394   : > { %v3018_v59 = vadd.f32 %v3017_v18, %v3016_v33 }
 0x395   : > { %v3019_v61 = vpop.f32.mrf.mxu1 }
 0x396   : > { %v1683_v20 = vpack.c.bf16 %v3018_v59, %v3015_v34 }
 0x397   : > { %v3020_v7 = vpop.f32.mrf.mxu1 }
 0x398   : > { %3222 = vmatmul.mubr.msk.bf16.gmra.mxu0 %vm1395_vm2, %v1683_v20  ;;  %v3021_v21 = vadd.f32 %v3020_v7, %v3019_v61 }
 0x399   : > { %v3022_v10 = vpop.f32.mrf.mxu1 }
 0x39b   : > { %v3023_v31 = vpop.f32.mrf.mxu1 }
 0x39c   : > { %v3024_v26 = vadd.f32 %v3023_v31, %v3022_v10 }
 0x39d   : > { %v3025_v23 = vpop.f32.mrf.mxu1 }
 0x39e   : > { %v1684_v35 = vpack.c.bf16 %v3024_v26, %v3021_v21 }
 0x39f   : > { %v3026_v24 = vpop.f32.mrf.mxu1 }
 0x3a0   : > { %3225 = vmatprep.mubr.msk.bf16.mxu0 %vm1395_vm2, %v1684_v35  ;;  %v3027_v22 = vadd.f32 %v3026_v24, %v3025_v23 }
 0x3a1   : > { %v3028_v8 = vpop.f32.mrf.mxu1 }
 0x3a3   : > { %v3029_v15 = vpop.f32.mrf.mxu1 }
 0x3a4   : > { %v3030_v28 = vadd.f32 %v3029_v15, %v3028_v8 }
 0x3a5   : > { %v3031_v30 = vpop.f32.mrf.mxu1 }
 0x3a6   : > { %v1685_v3 = vpack.c.bf16 %v3030_v28, %v3027_v22 }
 0x3a7   : > { %v3032_v27 = vpop.f32.mrf.mxu1 }
 0x3a8   : > { %3226 = vmatmul.mubr.msk.bf16.gmra.mxu0 %vm1395_vm2, %v1685_v3  ;;  %v3033_v17 = vadd.f32 %v3032_v27, %v3031_v30 }
 0x3a9   : > { %v3034_v49 = vpop.f32.mrf.mxu1 }
 0x3ab   : > { %v3035_v44 = vpop.f32.mrf.mxu1 }
 0x3ac   : > { %v3036_v16 = vadd.f32 %v3035_v44, %v3034_v49 }
 0x3ad   : > { %v3037_v41 = vpop.f32.mrf.mxu1 }
 0x3ae   : > { %v1686_v50 = vpack.c.bf16 %v3036_v16, %v3033_v17 }
 0x3af   : > { %v3038_v51 = vpop.f32.mrf.mxu1 }
 0x3b0   : > { %3229 = vmatprep.mubr.msk.bf16.mxu0 %vm1395_vm2, %v1686_v50  ;;  %v3039_v54 = vadd.f32 %v3038_v51, %v3037_v41 }
 0x3b1   : > { %v3040_v52 = vpop.f32.mrf.mxu1 }
 0x3b3   : > { %v3041_v53 = vpop.f32.mrf.mxu1 }
 0x3b4   : > { %v3042_v6 = vadd.f32 %v3041_v53, %v3040_v52 }
 0x3b5   : > { %v3043_v55 = vpop.f32.mrf.mxu1 }
 0x3b6   : > { %v1687_v45 = vpack.c.bf16 %v3042_v6, %v3039_v54 }
 0x3b7   : > { %v3044_v39 = vpop.f32.mrf.mxu1 }
 0x3b8   : > { %3230 = vmatmul.mubr.msk.bf16.gmra.mxu0 %vm1395_vm2, %v1687_v45  ;;  %v3045_v2 = vadd.f32 %v3044_v39, %v3043_v55 }
 0x3b9   : > { %v3046_v56 = vpop.f32.mrf.mxu1 }
 0x3bb   : > { %v3047_v57 = vpop.f32.mrf.mxu1 }
 0x3bc   : > { %v3048_v12 = vadd.f32 %v3047_v57, %v3046_v56 }
 0x3bd   : > { %v3049_v40 = vpop.f32.mrf.mxu1 }
 0x3be   : > { %v1688_v38 = vpack.c.bf16 %v3048_v12, %v3045_v2 }
 0x3bf   : > { %v3050_v60 = vpop.f32.mrf.mxu1 }
 0x3c0   : > { %3233 = vmatprep.mubr.msk.bf16.mxu0 %vm1395_vm2, %v1688_v38  ;;  %v3051_v4 = vadd.f32 %v3050_v60, %v3049_v40 }
 0x3c1   : > { %v3052_v5 = vpop.f32.mrf.mxu1 }
 0x3c3   : > { %v3053_v29 = vpop.f32.mrf.mxu1 }
 0x3c4   : > { %v3054_v47 = vadd.f32 %v3053_v29, %v3052_v5  ;;  %v4391_v29 = vld [vmem:[%s4847_s5] ss:$0 sm:$0xff] }
 0x3c5   : > { %v3055_v46 = vpop.f32.mrf.mxu1 }
 0x3c6   : > { %v1689_v9 = vpack.c.bf16 %v3054_v47, %v3051_v4 }
 0x3c7   : > { %v3056_v33 = vpop.f32.mrf.mxu1 }
 0x3c8   : > { %3234 = vmatmul.mubr.msk.bf16.gmra.mxu0 %vm1395_vm2, %v1689_v9  ;;  %v3057_v59 = vadd.f32 %v3056_v33, %v3055_v46 }
 0x3c9   : > { %v3058_v18 = vpop.f32.mrf.mxu1 }
 0x3cb   : > { %v3059_v34 = vpop.f32.mrf.mxu1 }
 0x3cc   : > { %v3060_v61 = vadd.f32 %v3059_v34, %v3058_v18  ;;  %v4397_v34 = vld [vmem:[%s4849_s7 + $0x1] ss:$0 sm:$0xff] }
 0x3cd   : > { %v3061_v20 = vpop.f32.mrf.mxu1 }
 0x3ce   : > { %v1690_v7 = vpack.c.bf16 %v3060_v61, %v3057_v59 }
 0x3cf   : > { %v3062_v10 = vpop.f32.mrf.mxu1 }
 0x3d0   : > { %3237 = vmatprep.mubr.msk.bf16.mxu0 %vm1395_vm2, %v1690_v7  ;;  %v3063_v26 = vadd.f32 %v3062_v10, %v3061_v20 }
 0x3d1   : > { %v3064_v31 = vpop.f32.mrf.mxu1 }
 0x3d3   : > { %v3065_v21 = vpop.f32.mrf.mxu1 }
 0x3d4   : > { %v3066_v23 = vadd.f32 %v3065_v21, %v3064_v31 }
 0x3d5   : > { %v3067_v35 = vpop.f32.mrf.mxu1 }
 0x3d6   : > { %v1691_v24 = vpack.c.bf16 %v3066_v23, %v3063_v26 }
 0x3d7   : > { %v3068_v8 = vpop.f32.mrf.mxu1 }
 0x3d8   : > { %3238 = vmatmul.mubr.msk.bf16.gmra.mxu0 %vm1395_vm2, %v1691_v24  ;;  %v3069_v28 = vadd.f32 %v3068_v8, %v3067_v35 }
 0x3d9   : > { %v3070_v15 = vpop.f32.mrf.mxu1 }
 0x3db   : > { %v3071_v22 = vpop.f32.mrf.mxu1 }
 0x3dc   : > { %v3072_v30 = vadd.f32 %v3071_v22, %v3070_v15 }
 0x3dd   : > { %v3073_v3 = vpop.f32.mrf.mxu1 }
 0x3de   : > { %v1692_v27 = vpack.c.bf16 %v3072_v30, %v3069_v28 }
 0x3df   : > { %v3074_v49 = vpop.f32.mrf.mxu1 }
 0x3e0   : > { %3241 = vmatprep.mubr.msk.bf16.mxu0 %vm1395_vm2, %v1692_v27  ;;  %v3075_v16 = vadd.f32 %v3074_v49, %v3073_v3 }
 0x3e1   : > { %v3076_v44 = vpop.f32.mrf.mxu1 }
 0x3e3   : > { %v3077_v17 = vpop.f32.mrf.mxu1 }
 0x3e4   : > { %v3078_v41 = vadd.f32 %v3077_v17, %v3076_v44 }
 0x3e6   : > { %v1693_v50 = vpack.c.bf16 %v3078_v41, %v3075_v16 }
 0x3e8   : > { %3242 = vmatmul.mubr.msk.bf16.gmra.mxu0 %vm1395_vm2, %v1693_v50 }
 0x3e9   : > { %3249 = vmatprep.mubr.msk.bf16.mxu0 %vm1395_vm2, %v3903_v11 }
 0x3f0   : > { %3250 = vmatmul.mubr.msk.bf16.vlgmr.msra.gmra.mxu0 %vm1395_vm2, %v3901_v19 }
 0x3f1   : > { %3253 = vmatprep.mubr.msk.bf16.mxu0 %vm1395_vm2, %v4204_v58 }
 0x3f8   : > { %3254 = vmatmul.mubr.msk.bf16.gmra.mxu0 %vm1395_vm2, %v4188_v14 }
 0x3f9   : > { %3257 = vmatprep.mubr.msk.bf16.mxu0 %vm1395_vm2, %v4172_v48 }
 0x400   : > { %3258 = vmatmul.mubr.msk.bf16.gmra.mxu0 %vm1395_vm2, %v4162_v36 }
 0x401   : > { %3261 = vmatprep.mubr.msk.bf16.mxu0 %vm1395_vm2, %v4150_v37 }
 0x408   : > { %3262 = vmatmul.mubr.msk.bf16.gmra.mxu0 %vm1395_vm2, %v4137_v25 }
 0x409   : > { %3265 = vmatprep.mubr.msk.bf16.mxu0 %vm1395_vm2, %v4222_v43 }
 0x410   : > { %3266 = vmatmul.mubr.msk.bf16.gmra.mxu0 %vm1395_vm2, %v4212_v42 }
 0x411   : > { %3269 = vmatprep.mubr.msk.bf16.mxu0 %vm1395_vm2, %v4196_v13 }
 0x418   : > { %3270 = vmatmul.mubr.msk.bf16.gmra.mxu0 %vm1395_vm2, %v4180_v1 }
 0x419   : > { %3273 = vmatprep.mubr.msk.bf16.mxu0 %vm1395_vm2, %v4114_v0 }
 0x420   : > { %3274 = vmatmul.mubr.msk.bf16.gmra.mxu0 %vm1395_vm2, %v4154_v32 }
 0x421   : > { %3277 = vmatprep.mubr.msk.bf16.mxu0 %vm1395_vm2, %v4141_v63 }
 0x428   : > { %3278 = vmatmul.mubr.msk.bf16.gmra.mxu0 %vm1395_vm2, %v4130_v62 }
 0x438   : > { %v3215_v19 = vpop.f32.mrf.mxu0 }
 0x43a   : > { %v1788_v11 = vpop.f32.mrf.mxu0 }
 0x43c   : > { %v3216_v25 = vpop.f32.mrf.mxu0 }
 0x43e   : > { %v1791_v37 = vpop.f32.mrf.mxu0 }
 0x448   : > { %v3219_v36 = vpop.f32.mrf.mxu0 }
 0x44a   : > { %v1804_v48 = vpop.f32.mrf.mxu0 }
 0x44c   : > { %v3220_v14 = vpop.f32.mrf.mxu0 }
 0x44e   : > { %v4338_v1 = vpop.f32.mrf.mxu0 }
 0x458   : > { %v4340_v13 = vpop.f32.mrf.mxu0 }
 0x45a   : > { %v4342_v0 = vpop.f32.mrf.mxu0 }
 0x45c   : > { %v4344_v32 = vpop.f32.mrf.mxu0 }
 0x45e   : > { %v4346_v58 = vpop.f32.mrf.mxu0 }
 0x468   : > { %v4348_v63 = vpop.f32.mrf.mxu0 }
 0x46a   : > { %v4350_v62 = vpop.f32.mrf.mxu0 }
 0x46c   : > { %v4352_v42 = vpop.f32.mrf.mxu0 }
 0x46e   : > { %v4354_v43 = vpop.f32.mrf.mxu0 }
 0x478   : > { %v4356_v51 = vpop.f32.mrf.mxu0 }
 0x47a   : > { %v4358_v52 = vpop.f32.mrf.mxu0 }
 0x47c   : > { %v4360_v53 = vpop.f32.mrf.mxu0 }
 0x47e   : > { %v4362_v54 = vpop.f32.mrf.mxu0 }
 0x488   : > { %v4364_v6 = vpop.f32.mrf.mxu0 }
 0x48a   : > { %v4366_v55 = vpop.f32.mrf.mxu0 }
 0x48c   : > { %v4368_v45 = vpop.f32.mrf.mxu0 }
 0x48e   : > { %v4370_v39 = vpop.f32.mrf.mxu0 }
 0x498   : > { %v4372_v56 = vpop.f32.mrf.mxu0 }
 0x49a   : > { %v4374_v57 = vpop.f32.mrf.mxu0 }
 0x49c   : > { %v4376_v2 = vpop.f32.mrf.mxu0 }
 0x49e   : > { %v4378_v12 = vpop.f32.mrf.mxu0 }
 0x4a8   : > { %v4380_v40 = vpop.f32.mrf.mxu0 }
 0x4aa   : > { %v4382_v38 = vpop.f32.mrf.mxu0 }
 0x4ac   : > { %v4384_v60 = vpop.f32.mrf.mxu0 }
 0x4ae   : > { %v4386_v5 = vpop.f32.mrf.mxu0 }
 0x4b0   : > { %v3251_v4 = vpop.f32.mrf.mxu0 }
 0x4b1   : > { %v2018_v47 = vadd.f32 %v3251_v4, %v3215_v19 }
 0x4b2   : > { %v2009_v46 = vpop.f32.mrf.mxu0 }
 0x4b3   : > { %v2144_v9 = vadd.f32 %v4391_v29, %v2018_v47  ;;  %v2010_v33 = vadd.f32 %v2009_v46, %v1788_v11 }
 0x4b4   : > { %v3252_v18 = vpop.f32.mrf.mxu0 }
 0x4b5   : > { %v2176_v59 = vmax.f32 %v2144_v9, 0.0  ;;  %v2142_v61 = vadd.f32 %v4391_v29, %v2010_v33  ;;  %v2021_v20 = vadd.f32 %v3252_v18, %v3216_v25 }
 0x4b6   : > { %v2012_v7 = vpop.f32.mrf.mxu0 }
 0x4b7   : > { %v2174_v10 = vmax.f32 %v2142_v61, 0.0  ;;  %v2145_v31 = vadd.f32 %v4391_v29, %v2021_v20  ;;  %v2013_v21 = vadd.f32 %v2012_v7, %v1791_v37  ;;  %v2216_v26 = vmul.f32 %v4397_v34, %v2176_v59 }
 0x4b8   : > { %v3255_v23 = vpop.f32.mrf.mxu0 }
 0x4b9   : > { %v2177_v35 = vmax.f32 %v2145_v31, 0.0  ;;  %v2143_v24 = vadd.f32 %v4391_v29, %v2013_v21  ;;  %v2034_v8 = vadd.f32 %v3255_v23, %v3219_v36  ;;  %v2252_v15 = vsel %vm1395_vm2, %v2216_v26, 0.0 }
 0x4ba   : > { %2253 = vadd.xlane.f32.xlu1 %v2252_v15  ;;  %v2025_v22 = vpop.f32.mrf.mxu0  ;;  %v2214_v28 = vmul.f32 %v4397_v34, %v2174_v10 }
 0x4bb   : > { %v2026_v30 = vadd.f32 %v2025_v22, %v1804_v48  ;;  %v2175_v27 = vmax.f32 %v2143_v24, 0.0  ;;  %v2148_v49 = vadd.f32 %v4391_v29, %v2034_v8  ;;  %v2217_v17 = vmul.f32 %v4397_v34, %v2177_v35 }
 0x4bc   : > { %v3256_v3 = vpop.f32.mrf.mxu0  ;;  %v2246_v44 = vsel %vm1395_vm2, %v2214_v28, 0.0 }
 0x4bd   : > { %v2146_v41 = vadd.f32 %v4391_v29, %v2026_v30  ;;  %v2180_v19 = vmax.f32 %v2148_v49, 0.0  ;;  %v2037_v11 = vadd.f32 %v3256_v3, %v3220_v14  ;;  %v2255_v25 = vsel %vm1395_vm2, %v2217_v17, 0.0 }
 0x4be   : > { %v2028_v16 = vpop.f32.mrf.mxu0  ;;  %2247 = vadd.xlane.f32.xlu1 %v2246_v44  ;;  %v2215_v37 = vmul.f32 %v4397_v34, %v2175_v27 }
 0x4bf   : > { %v2178_v48 = vmax.f32 %v2146_v41, 0.0  ;;  %v2149_v47 = vadd.f32 %v4391_v29, %v2037_v11  ;;  %v2029_v46 = vadd.f32 %v2028_v16, %v4338_v1  ;;  %v2220_v33 = vmul.f32 %v4397_v34, %v2180_v19  ;;  %v2475_v19 = vld [vmem:[#allocation2] sm:$0x1] }
 0x4c0   : > { %v3259_v50 = vpop.f32.mrf.mxu0  ;;  %v2249_v9 = vsel %vm1395_vm2, %v2215_v37, 0.0 }
 0x4c1   : > { %v2050_v14 = vadd.f32 %v3259_v50, %v4340_v13  ;;  %v2181_v61 = vmax.f32 %v2149_v47, 0.0  ;;  %v2147_v20 = vadd.f32 %v4391_v29, %v2029_v46  ;;  %v2264_v7 = vsel %vm1395_vm2, %v2220_v33, 0.0 }
 0x4c2   : > { %v2041_v36 = vpop.f32.mrf.mxu0  ;;  %2256 = vadd.xlane.f32.xlu1 %v2255_v25  ;;  %v2218_v10 = vmul.f32 %v4397_v34, %v2178_v48 }
 0x4c3   : > { %v2042_v1 = vadd.f32 %v2041_v36, %v4342_v0  ;;  %v2152_v21 = vadd.f32 %v4391_v29, %v2050_v14  ;;  %v2179_v23 = vmax.f32 %v2147_v20, 0.0  ;;  %v2221_v13 = vmul.f32 %v4397_v34, %v2181_v61 }
 0x4c4   : > { %v3260_v4 = vpop.f32.mrf.mxu0  ;;  %v2258_v35 = vsel %vm1395_vm2, %v2218_v10, 0.0  ;;  %v3409_v36 = vmov 0  }
 0x4c5   : > { %v2150_v8 = vadd.f32 %v4391_v29, %v2042_v1  ;;  %v2184_v15 = vmax.f32 %v2152_v21, 0.0  ;;  %v2053_v22 = vadd.f32 %v3260_v4, %v4344_v32  ;;  %v2267_v30 = vsel %vm1395_vm2, %v2221_v13, 0.0  ;;  %3348 = vset.pattern.permute.xlu0 %v3409_v36 }
 0x4c6   : > { %v2044_v18 = vpop.f32.mrf.mxu0  ;;  %2250 = vadd.xlane.f32.xlu1 %v2249_v9  ;;  %v2219_v3 = vmul.f32 %v4397_v34, %v2179_v23  ;;  %2478 = vperm.xlu0 %3348, %v2475_v19  }
 0x4c7   : > { %v2182_v49 = vmax.f32 %v2150_v8, 0.0  ;;  %v2153_v16 = vadd.f32 %v4391_v29, %v2053_v22  ;;  %v2045_v41 = vadd.f32 %v2044_v18, %v4346_v58  ;;  %v2224_v32 = vmul.f32 %v4397_v34, %v2184_v15 }
 0x4c8   : > { %v3263_v59 = vpop.f32.mrf.mxu0  ;;  %v2261_v37 = vsel %vm1395_vm2, %v2219_v3, 0.0 }
 0x4c9   : > { %v2185_v46 = vmax.f32 %v2153_v16, 0.0  ;;  %v2151_v9 = vadd.f32 %v4391_v29, %v2045_v41  ;;  %v2276_v18 = vsel %vm1395_vm2, %v2224_v32, 0.0 }
 0x4ca   : > { %v2057_v31 = vpop.f32.mrf.mxu0  ;;  %2265 = vadd.xlane.f32.xlu1 %v2264_v7  ;;  %v2222_v7 = vmul.f32 %v4397_v34, %v2182_v49 }
 0x4cb   : > { %v2183_v23 = vmax.f32 %v2151_v9, 0.0  ;;  %v2225_v8 = vmul.f32 %v4397_v34, %v2185_v46 }
 0x4cc   : > { %v4421_v26 = vpop.f32.mrf.mxu0 }
 0x4cd   : > { %v2279_v16 = vsel %vm1395_vm2, %v2225_v8, 0.0  ;;  %v2223_v19 = vmul.f32 %v4397_v34, %v2183_v23 }
 0x4ce   : > { %v4425_v24 = vpop.f32.mrf.mxu0  ;;  %2259 = vadd.xlane.f32.xlu1 %v2258_v35 }
 0x4cf   : > { %v2273_v9 = vsel %vm1395_vm2, %v2223_v19, 0.0 }
 0x4d0   : > { %v3267_v28 = vpop.f32.mrf.mxu0 }
 0x4d1   : > { %v2082_v0 = vadd.f32 %v3267_v28, %v4356_v51 }
 0x4d2   : > { %v2073_v27 = vpop.f32.mrf.mxu0  ;;  %2268 = vadd.xlane.f32.xlu1 %v2267_v30 }
 0x4d3   : > { %v2160_v44 = vadd.f32 %v4391_v29, %v2082_v0  ;;  %v2074_v17 = vadd.f32 %v2073_v27, %v4358_v52  ;;  %v2270_v0 = vsel %vm1395_vm2, %v2222_v7, 0.0 }
 0x4d4   : > { %v3268_v50 = vpop.f32.mrf.mxu0 }
 0x4d5   : > { %v2192_v51 = vmax.f32 %v2160_v44, 0.0  ;;  %v2158_v11 = vadd.f32 %v4391_v29, %v2074_v17  ;;  %v2085_v25 = vadd.f32 %v3268_v50, %v4360_v53  ;;  %v2066_v53 = vadd.f32 %v3263_v59, %v4348_v63 }
 0x4d6   : > { %v2076_v48 = vpop.f32.mrf.mxu0  ;;  %2262 = vadd.xlane.f32.xlu1 %v2261_v37 }
 0x4d7   : > { %v2190_v52 = vmax.f32 %v2158_v11, 0.0  ;;  %v2161_v4 = vadd.f32 %v4391_v29, %v2085_v25  ;;  %v2077_v58 = vadd.f32 %v2076_v48, %v4362_v54  ;;  %v4443_v47 = vmul.f32 %v4397_v34, %v2192_v51 }
 0x4d8   : > { %v3271_v33 = vpop.f32.mrf.mxu0  ;;  %v2156_v35 = vadd.f32 %v4391_v29, %v2066_v53 }
 0x4d9   : > { %v2193_v14 = vmax.f32 %v2161_v4, 0.0  ;;  %v2159_v61 = vadd.f32 %v4391_v29, %v2077_v58  ;;  %v2098_v20 = vadd.f32 %v3271_v33, %v4364_v6  ;;  %v4452_v54 = vmul.f32 %v4397_v34, %v2190_v52 }
 0x4da   : > { %v2089_v10 = vpop.f32.mrf.mxu0  ;;  %2277 = vadd.xlane.f32.xlu1 %v2276_v18  ;;  %v2058_v6 = vadd.f32 %v2057_v31, %v4350_v62  ;;  %v2188_v49 = vmax.f32 %v2156_v35, 0.0 }
 0x4db   : > { %v2191_v1 = vmax.f32 %v2159_v61, 0.0  ;;  %v2164_v21 = vadd.f32 %v4391_v29, %v2098_v20  ;;  %v2090_v63 = vadd.f32 %v2089_v10, %v4366_v55  ;;  %v4457_v59 = vmul.f32 %v4397_v34, %v2193_v14 }
 0x4dc   : > { %v3272_v13 = vpop.f32.mrf.mxu0  ;;  %v2154_v44 = vadd.f32 %v4391_v29, %v2058_v6  ;;  %v2228_v52 = vmul.f32 %v4397_v34, %v2188_v49 }
 0x4dd   : > { %v2196_v15 = vmax.f32 %v2164_v21, 0.0  ;;  %v2162_v22 = vadd.f32 %v4391_v29, %v2090_v63  ;;  %v2101_v28 = vadd.f32 %v3272_v13, %v4368_v45  ;;  %v4466_v55 = vmul.f32 %v4397_v34, %v2191_v1 }
 0x4de   : > { %v2092_v30 = vpop.f32.mrf.mxu0  ;;  %2271 = vadd.xlane.f32.xlu1 %v2270_v0  ;;  %v2069_v45 = vadd.f32 %v4421_v26, %v4352_v42  ;;  %v2186_v37 = vmax.f32 %v2154_v44, 0.0 }
 0x4df   : > { %v2194_v3 = vmax.f32 %v2162_v22, 0.0  ;;  %v2165_v27 = vadd.f32 %v4391_v29, %v2101_v28  ;;  %v2093_v62 = vadd.f32 %v2092_v30, %v4370_v39  ;;  %v4471_v31 = vmul.f32 %v4397_v34, %v2196_v15 }
 0x4e0   : > { %v3275_v17 = vpop.f32.mrf.mxu0  ;;  %v2157_v36 = vadd.f32 %v4391_v29, %v2069_v45  ;;  %v2226_v21 = vmul.f32 %v4397_v34, %v2186_v37  ;;  %v2303_v37 = vsel %vm1395_vm2, %v4457_v59, 0.0 }
 0x4e1   : > { %v2197_v41 = vmax.f32 %v2165_v27, 0.0  ;;  %v2163_v50 = vadd.f32 %v4391_v29, %v2093_v62  ;;  %v2114_v32 = vadd.f32 %v3275_v17, %v4372_v56  ;;  %v4481_v51 = vmul.f32 %v4397_v34, %v2194_v3 }
 0x4e2   : > { %v2105_v39 = vpop.f32.mrf.mxu0  ;;  %2280 = vadd.xlane.f32.xlu1 %v2279_v16  ;;  %v2061_v56 = vadd.f32 %v4425_v24, %v4354_v43  ;;  %v2189_v14 = vmax.f32 %v2157_v36, 0.0  ;;  %v2282_v30 = vsel %vm1395_vm2, %v2226_v21, 0.0 }
 0x4e3   : > { %v2195_v11 = vmax.f32 %v2163_v50, 0.0  ;;  %v2168_v25 = vadd.f32 %v4391_v29, %v2114_v32  ;;  %v2106_v42 = vadd.f32 %v2105_v39, %v4374_v57  ;;  %v4486_v26 = vmul.f32 %v4397_v34, %v2197_v41 }
 0x4e4   : > { %v3276_v48 = vpop.f32.mrf.mxu0  ;;  %v2155_v61 = vadd.f32 %v4391_v29, %v2061_v56  ;;  %v2229_v22 = vmul.f32 %v4397_v34, %v2189_v14  ;;  %v3410_v39 = vmov 0.0   ;;  %v2312_v56 = vsel %vm1395_vm2, %v4471_v31, 0.0 }
 0x4e5   : > { %v2200_v4 = vmax.f32 %v2168_v25, 0.0  ;;  %v2166_v58 = vadd.f32 %v4391_v29, %v2106_v42  ;;  %v2117_v46 = vadd.f32 %v3276_v48, %v4376_v2  ;;  %v4496_v53 = vmul.f32 %v4397_v34, %v2195_v11  ;;  %3281 = vmatprep.subr.mxu1 %v3410_v39  ;;  %v4554_v42 = vpop.xlane.xlu0 %1403  ;;  %3313 = vmatprep.mubr.msk.f32.mxu1 %vm3411_vm3, %v3410_v39 }
 0x4e6   : > { %v2108_v57 = vpop.f32.mrf.mxu0  ;;  %2274 = vadd.xlane.f32.xlu1 %v2273_v9  ;;  %v2288_v2 = vsel %vm1395_vm2, %v2228_v52, 0.0  ;;  %v2187_v8 = vmax.f32 %v2155_v61, 0.0  ;;  %v2291_v45 = vsel %vm1395_vm2, %v2229_v22, 0.0  ;;  %v2300_v11 = vsel %vm1395_vm2, %v4443_v47, 0.0  ;;  %v2496_v9 = vld [vmem:[%s4851_s9 + $0x50] sm:$0xff]  ;;  %v2489_v22 = vld [vmem:[%s4851_s9 + $0x18] sm:$0xff] }
 0x4e7   : > { %v2198_v33 = vmax.f32 %v2166_v58, 0.0  ;;  %v2169_v18 = vadd.f32 %v4391_v29, %v2117_v46  ;;  %v2109_v43 = vadd.f32 %v2108_v57, %v4378_v12  ;;  %v4501_v24 = vmul.f32 %v4397_v34, %v2200_v4 }
 0x4e8   : > { %v3279_v20 = vpop.f32.mrf.mxu0  ;;  %v2227_v16 = vmul.f32 %v4397_v34, %v2187_v8  ;;  %v2294_v25 = vsel %vm1395_vm2, %v4452_v54, 0.0  ;;  %v2297_v47 = vsel %vm1395_vm2, %v4466_v55, 0.0  ;;  %v2499_v54 = vld [vmem:[%s4851_s9 + $0x68] sm:$0xff]  ;;  %v2306_v59 = vsel %vm1395_vm2, %v4481_v51, 0.0  ;;  %v2498_v55 = vld [vmem:[%s4851_s9 + $0x60] sm:$0xff]  ;;  %v2497_v51 = vld [vmem:[%s4851_s9 + $0x58] sm:$0xff] }
 0x4e9   : > { %v2201_v7 = vmax.f32 %v2169_v18, 0.0  ;;  %v2167_v10 = vadd.f32 %v4391_v29, %v2109_v43  ;;  %v2130_v1 = vadd.f32 %v3279_v20, %v4380_v40  ;;  %v4509_v12 = vmul.f32 %v4397_v34, %v2198_v33  ;;  %v4563_v36 = vpop.xlane.xlu0 %1397  ;;  %v2495_v43 = vld [vmem:[%s4851_s9 + $0x48] sm:$0xff]  ;;  %v2494_v20 = vld [vmem:[%s4851_s9 + $0x40] sm:$0xff] }
 0x4ea   : > { %v2121_v63 = vpop.f32.mrf.mxu0  ;;  %2289 = vadd.xlane.f32.xlu1 %v2288_v2  ;;  %v2315_v52 = vsel %vm1395_vm2, %v4486_v26, 0.0  ;;  %v2309_v31 = vsel %vm1395_vm2, %v4496_v53, 0.0  ;;  %v2324_v46 = vsel %vm1395_vm2, %v4501_v24, 0.0  ;;  %v2490_v8 = vld [vmem:[%s4851_s9 + $0x20] sm:$0xff] }
 0x4eb   : > { %v2199_v23 = vmax.f32 %v2167_v10, 0.0  ;;  %v2172_v35 = vadd.f32 %v4391_v29, %v2130_v1  ;;  %v2122_v6 = vadd.f32 %v2121_v63, %v4382_v38  ;;  %v4514_v13 = vmul.f32 %v4397_v34, %v2201_v7  ;;  %v2493_v1 = vld [vmem:[%s4851_s9 + $0x38] sm:$0xff] }
 0x4ec   : > { %v3280_v15 = vpop.f32.mrf.mxu0  ;;  %v2318_v26 = vsel %vm1395_vm2, %v4509_v12, 0.0  ;;  %v2492_v12 = vld [vmem:[%s4851_s9 + $0x30] sm:$0xff] }
 0x4ed   : > { %v2204_v40 = vmax.f32 %v2172_v35, 0.0  ;;  %v2170_v28 = vadd.f32 %v4391_v29, %v2122_v6  ;;  %v2133_v0 = vadd.f32 %v3280_v15, %v4384_v60  ;;  %v4521_v27 = vmul.f32 %v4397_v34, %v2199_v23  ;;  %v4568_v48 = vpop.xlane.xlu0 %1406 }
 0x4ee   : > { %v2124_v3 = vpop.f32.mrf.mxu0  ;;  %2283 = vadd.xlane.f32.xlu1 %v2282_v30  ;;  %v2327_v53 = vsel %vm1395_vm2, %v4514_v13, 0.0  ;;  %v2491_v13 = vld [vmem:[%s4851_s9 + $0x28] sm:$0xff] }
 0x4ef   : > { %v2202_v38 = vmax.f32 %v2170_v28, 0.0  ;;  %v2173_v62 = vadd.f32 %v4391_v29, %v2133_v0  ;;  %v2125_v49 = vadd.f32 %v2124_v3, %v4386_v5  ;;  %v4526_v44 = vmul.f32 %v4397_v34, %v2204_v40  ;;  %v2488_v28 = vld [vmem:[%s4851_s9 + $0x10] sm:$0xff]  ;;  %v2374_v3 = vld [vmem:[%s4848_s6] sm:$0xff] }
 0x4f0   : > { %v2285_v5 = vsel %vm1395_vm2, %v2227_v16, 0.0  ;;  %v2321_v18 = vsel %vm1395_vm2, %v4521_v27, 0.0  ;;  %v2375_v27 = vld [vmem:[%s4848_s6 + $0x8] sm:$0xff] }
 0x4f1   : > { %v2205_v17 = vmax.f32 %v2173_v62, 0.0  ;;  %v2171_v60 = vadd.f32 %v4391_v29, %v2125_v49  ;;  %v4532_v41 = vmul.f32 %v4397_v34, %v2202_v38  ;;  %v2501_v29 = vld [vmem:[%s4851_s9 + $0x78] sm:$0xff]  ;;  %v4578_v4 = vpop.xlane.xlu0 %1400  ;;  %v2336_v24 = vsel %vm1395_vm2, %v4526_v44, 0.0  ;;  %v2376_v44 = vld [vmem:[%s4848_s6 + $0x10] sm:$0xff] }
 0x4f2   : > { %2292 = vadd.xlane.f32.xlu1 %v2291_v45  ;;  %3282 = vmatpush3.msra.mxu1 %v2501_v29  ;;  %v2487_v45 = vld [vmem:[%s4851_s9 + $0x8] sm:$0xff] }
 0x4f3   : > { %v2203_v50 = vmax.f32 %v2171_v60, 0.0  ;;  %v4535_v32 = vmul.f32 %v4397_v34, %v2205_v17  ;;  %3283 = vmatprep.subr.mxu1 %v3410_v39  ;;  %v2330_v61 = vsel %vm1395_vm2, %v4532_v41, 0.0  ;;  %v2486_v41 = vld [vmem:[%s4851_s9] sm:$0xff] }
 0x4f5   : > { %v4539_v19 = vmul.f32 %v4397_v34, %v2203_v50  ;;  %v2500_v34 = vld [vmem:[%s4851_s9 + $0x70] sm:$0xff]  ;;  %v4586_v58 = vpop.xlane.xlu0 %1415  ;;  %v2339_v10 = vsel %vm1395_vm2, %v4535_v32, 0.0  ;;  %v2377_v50 = vld [vmem:[%s4848_s6 + $0x18] sm:$0xff] }
 0x4f6   : > { %2286 = vadd.xlane.f32.xlu1 %v2285_v5  ;;  %3284 = vmatpush3.msra.mxu1 %v2500_v34 }
 0x4f7   : > { %3285 = vmatprep.subr.mxu1 %v3410_v39  ;;  %v2333_v7 = vsel %vm1395_vm2, %v4539_v19, 0.0 }
 0x4f8   : > { %3286 = vmatpush3.msra.mxu1 %v2499_v54 }
 0x4f9   : > { %3287 = vmatprep.subr.mxu1 %v3410_v39  ;;  %v4595_v57 = vpop.xlane.xlu0 %1409 }
 0x4fa   : > { %2301 = vadd.xlane.f32.xlu1 %v2300_v11  ;;  %3288 = vmatpush3.msra.mxu1 %v2498_v55 }
 0x4fb   : > { %3289 = vmatprep.subr.mxu1 %v3410_v39 }
 0x4fc   : > { %3290 = vmatpush3.msra.mxu1 %v2497_v51 }
 0x4fd   : > { %3291 = vmatprep.subr.mxu1 %v3410_v39  ;;  %v4600_v33 = vpop.xlane.xlu0 %1418 }
 0x4fe   : > { %2295 = vadd.xlane.f32.xlu1 %v2294_v25  ;;  %3292 = vmatpush3.msra.mxu1 %v2496_v9 }
 0x4ff   : > { %3293 = vmatprep.subr.mxu1 %v3410_v39 }
 0x500   : > { %3294 = vmatpush3.msra.mxu1 %v2495_v43 }
 0x501   : > { %3295 = vmatprep.subr.mxu1 %v3410_v39  ;;  %v4610_v14 = vpop.xlane.xlu0 %1412 }
 0x502   : > { %2304 = vadd.xlane.f32.xlu1 %v2303_v37  ;;  %3296 = vmatpush3.msra.mxu1 %v2494_v20 }
 0x503   : > { %3297 = vmatprep.subr.mxu1 %v3410_v39 }
 0x504   : > { %3298 = vmatpush3.msra.mxu1 %v2493_v1 }
 0x505   : > { %v4618_v2 = vpop.xlane.xlu0 %1427  ;;  %3299 = vmatprep.subr.mxu1 %v3410_v39 }
 0x506   : > { %2298 = vadd.xlane.f32.xlu1 %v2297_v47  ;;  %3300 = vmatpush3.msra.mxu1 %v2492_v12 }
 0x507   : > { %3301 = vmatprep.subr.mxu1 %v3410_v39 }
 0x508   : > { %3302 = vmatpush3.msra.mxu1 %v2491_v13 }
 0x509   : > { %v4627_v21 = vpop.xlane.xlu0 %1421  ;;  %3303 = vmatprep.subr.mxu1 %v3410_v39 }
 0x50a   : > { %2313 = vadd.xlane.f32.xlu1 %v2312_v56  ;;  %3304 = vmatpush3.msra.mxu1 %v2490_v8 }
 0x50b   : > { %3305 = vmatprep.subr.mxu1 %v3410_v39 }
 0x50c   : > { %3306 = vmatpush3.msra.mxu1 %v2489_v22  ;;  %v2383_v22 = vld [vmem:[%s4848_s6 + $0x48] sm:$0xff] }
 0x50d   : > { %v4630_v63 = vpop.xlane.xlu0 %1430  ;;  %3307 = vmatprep.subr.mxu1 %v3410_v39 }
 0x50e   : > { %2307 = vadd.xlane.f32.xlu1 %v2306_v59  ;;  %3308 = vmatpush3.msra.mxu1 %v2488_v28 }
 0x50f   : > { %3309 = vmatprep.subr.mxu1 %v3410_v39 }
 0x510   : > { %3310 = vmatpush3.msra.mxu1 %v2487_v45 }
 0x511   : > { %v4636_v23 = vpop.xlane.xlu0 %1424  ;;  %3311 = vmatprep.subr.mxu1 %v3410_v39 }
 0x512   : > { %2316 = vadd.xlane.f32.xlu1 %v2315_v52  ;;  %3312 = vmatpush3.msra.mxu1 %v2486_v41 }
 0x513   : > { %3316 = vmatprep.subr.mxu1 %v3410_v39 }
 0x515   : > { %v4644_v15 = vpop.xlane.xlu0 %1439 }
 0x516   : > { %2310 = vadd.xlane.f32.xlu1 %v2309_v31  ;;  %v2378_v31 = vld [vmem:[%s4848_s6 + $0x20] sm:$0xff] }
 0x519   : > { %v4656_v30 = vpop.xlane.xlu0 %1433 }
 0x51a   : > { %2325 = vadd.xlane.f32.xlu1 %v2324_v46 }
 0x51d   : > { %v4683_v29 = vpop.xlane.xlu0 %1442 }
 0x51e   : > { %2319 = vadd.xlane.f32.xlu1 %v2318_v26  ;;  %v2379_v26 = vld [vmem:[%s4848_s6 + $0x28] sm:$0xff] }
 0x521   : > { %v1437_v37 = vpop.xlane.xlu0 %1436 }
 0x522   : > { %2328 = vadd.xlane.f32.xlu1 %v2327_v53 }
 0x526   : > { %2322 = vadd.xlane.f32.xlu1 %v2321_v18 }
 0x52a   : > { %2337 = vadd.xlane.f32.xlu1 %v2336_v24 }
 0x52e   : > { %2331 = vadd.xlane.f32.xlu1 %v2330_v61 }
 0x532   : > { %2334 = vadd.xlane.f32.xlu1 %v2333_v7 }
 0x536   : > { %2340 = vadd.xlane.f32.xlu1 %v2339_v10 }
 0x543   : > { %v2254_v35 = vpop.xlane.xlu1 %2253 }
 0x544   : > { %v2344_v62 = vadd.f32 %v2254_v35, %v4554_v42  ;;  %v2381_v35 = vld [vmem:[%s4848_s6 + $0x38] sm:$0xff] }
 0x546   : > { %v2408_v5 = vmul.f32 %v2376_v44, %v2344_v62  ;;  %v2384_v62 = vld [vmem:[%s4848_s6 + $0x50] sm:$0xff] }
 0x547   : > { %v2248_v6 = vpop.xlane.xlu1 %2247 }
 0x548   : > { %v2342_v0 = vadd.f32 %v2248_v6, %v4563_v36  ;;  %v4686_v36 = vpop.xlane.xlu0 %1451 }
 0x54a   : > { %v2406_v17 = vmul.f32 %v2374_v3, %v2342_v0 }
 0x54b   : > { %v2257_v40 = vpop.xlane.xlu1 %2256 }
 0x54c   : > { %v2345_v60 = vadd.f32 %v2257_v40, %v4568_v48  ;;  %v4688_v48 = vpop.xlane.xlu0 %1445 }
 0x54e   : > { %v2409_v11 = vmul.f32 %v2377_v50, %v2345_v60 }
 0x54f   : > { %v2251_v38 = vpop.xlane.xlu1 %2250 }
 0x550   : > { %v2343_v49 = vadd.f32 %v2251_v38, %v4578_v4  ;;  %v4690_v52 = vpop.xlane.xlu0 %1454 }
 0x552   : > { %v2407_v16 = vmul.f32 %v2375_v27, %v2343_v49 }
 0x553   : > { %v2266_v32 = vpop.xlane.xlu1 %2265 }
 0x554   : > { %v2438_v19 = vadd.f32 %v2407_v16, %v2406_v17  ;;  %v1449_v53 = vpop.xlane.xlu0 %1448  ;;  %v2348_v24 = vadd.f32 %v2266_v32, %v4586_v58  ;;  %v2382_v58 = vld [vmem:[%s4848_s6 + $0x40] sm:$0xff]  ;;  %v2385_v16 = vld [vmem:[%s4848_s6 + $0x58] sm:$0xff] }
 0x556   : > { %v2439_v25 = vadd.f32 %v2438_v19, %v2408_v5  ;;  %v2387_v5 = vld [vmem:[%s4848_s6 + $0x68] sm:$0xff] }
 0x557   : > { %v2260_v34 = vpop.xlane.xlu1 %2259 }
 0x558   : > { %v2440_v42 = vadd.f32 %v2439_v25, %v2409_v11  ;;  %v2346_v4 = vadd.f32 %v2260_v34, %v4595_v57  ;;  %v2380_v57 = vld [vmem:[%s4848_s6 + $0x30] sm:$0xff]  ;;  %v4704_v10 = vpop.xlane.xlu0 %1463 }
 0x55a   : > { %v2410_v9 = vmul.f32 %v2378_v31, %v2346_v4 }
 0x55b   : > { %v2269_v47 = vpop.xlane.xlu1 %2268 }
 0x55c   : > { %v2441_v61 = vadd.f32 %v2440_v42, %v2410_v9  ;;  %v2349_v1 = vadd.f32 %v2269_v47, %v4600_v33  ;;  %v1458_v28 = vpop.xlane.xlu0 %1457 }
 0x55e   : > { %v2413_v40 = vmul.f32 %v2381_v35, %v2349_v1 }
 0x55f   : > { %v2263_v54 = vpop.xlane.xlu1 %2262 }
 0x560   : > { %v2347_v46 = vadd.f32 %v2263_v54, %v4610_v14  ;;  %v2412_v14 = vmul.f32 %v2380_v57, %v2348_v24  ;;  %v2388_v54 = vld [vmem:[%s4848_s6 + $0x70] sm:$0xff] }
 0x562   : > { %v2411_v43 = vmul.f32 %v2379_v26, %v2347_v46 }
 0x563   : > { %v2278_v56 = vpop.xlane.xlu1 %2277 }
 0x564   : > { %v2442_v7 = vadd.f32 %v2441_v61, %v2411_v43  ;;  %v2352_v27 = vadd.f32 %v2278_v56, %v4618_v2  ;;  %v2386_v2 = vld [vmem:[%s4848_s6 + $0x60] sm:$0xff] }
 0x566   : > { %v2443_v13 = vadd.f32 %v2442_v7, %v2412_v14  ;;  %v2416_v45 = vmul.f32 %v2384_v62, %v2352_v27  ;;  %v2392_v14 = vld [vmem:[%s4848_s6 + $0x90] sm:$0xff] }
 0x567   : > { %v2272_v59 = vpop.xlane.xlu1 %2271 }
 0x568   : > { %v2350_v12 = vadd.f32 %v2272_v59, %v4627_v21  ;;  %v2444_v0 = vadd.f32 %v2443_v13, %v2413_v40  ;;  %v2393_v13 = vld [vmem:[%s4848_s6 + $0x98] sm:$0xff] }
 0x56a   : > { %v2414_v33 = vmul.f32 %v2382_v58, %v2350_v12 }
 0x56b   : > { %v2281_v55 = vpop.xlane.xlu1 %2280 }
 0x56c   : > { %v2445_v38 = vadd.f32 %v2444_v0, %v2414_v33  ;;  %v2353_v17 = vadd.f32 %v2281_v55, %v4630_v63  ;;  %v2395_v33 = vld [vmem:[%s4848_s6 + $0xa8] sm:$0xff] }
 0x56e   : > { %v2417_v19 = vmul.f32 %v2385_v16, %v2353_v17 }
 0x56f   : > { %v2275_v51 = vpop.xlane.xlu1 %2274 }
 0x570   : > { %v2351_v8 = vadd.f32 %v2275_v51, %v4636_v23  ;;  %v4722_v23 = vpop.xlane.xlu0 %1466  ;;  %v2389_v51 = vld [vmem:[%s4848_s6 + $0x78] sm:$0xff] }
 0x572   : > { %v2415_v3 = vmul.f32 %v2383_v22, %v2351_v8 }
 0x573   : > { %v2290_v18 = vpop.xlane.xlu1 %2289 }
 0x574   : > { %v2446_v44 = vadd.f32 %v2445_v38, %v2415_v3  ;;  %v1461_v63 = vpop.xlane.xlu0 %1460  ;;  %v2356_v42 = vadd.f32 %v2290_v18, %v4644_v15  ;;  %v2390_v15 = vld [vmem:[%s4848_s6 + $0x80] sm:$0xff]  ;;  %v2391_v18 = vld [vmem:[%s4848_s6 + $0x88] sm:$0xff] }
 0x576   : > { %v2447_v50 = vadd.f32 %v2446_v44, %v2416_v45  ;;  %v2420_v55 = vmul.f32 %v2388_v54, %v2356_v42  ;;  %v2400_v54 = vld [vmem:[%s4848_s6 + $0xd0] sm:$0xff] }
 0x577   : > { %v2284_v20 = vpop.xlane.xlu1 %2283 }
 0x578   : > { %v2354_v60 = vadd.f32 %v2284_v20, %v4656_v30  ;;  %v2448_v30 = vadd.f32 %v2447_v50, %v2417_v19 }
 0x57a   : > { %v2418_v11 = vmul.f32 %v2386_v2, %v2354_v60 }
 0x57b   : > { %v2293_v6 = vpop.xlane.xlu1 %2292 }
 0x57c   : > { %v2449_v47 = vadd.f32 %v2448_v30, %v2418_v11  ;;  %v2357_v4 = vadd.f32 %v2293_v6, %v4683_v29 }
 0x57e   : > { %v2421_v43 = vmul.f32 %v2389_v51, %v2357_v4  ;;  %v2401_v51 = vld [vmem:[%s4848_s6 + $0xd8] sm:$0xff] }
 0x57f   : > { %v2287_v21 = vpop.xlane.xlu1 %2286 }
 0x580   : > { %v2355_v32 = vadd.f32 %v2287_v21, %v1437_v37  ;;  %v1476_v37 = vpop.xlane.xlu0 %1475 }
 0x582   : > { %v2419_v34 = vmul.f32 %v2387_v5, %v2355_v32 }
 0x583   : > { %v2302_v49 = vpop.xlane.xlu1 %2301 }
 0x584   : > { %v2450_v59 = vadd.f32 %v2449_v47, %v2419_v34  ;;  %v1470_v29 = vpop.xlane.xlu0 %1469  ;;  %v2360_v20 = vadd.f32 %v2302_v49, %v4686_v36  ;;  %v2394_v36 = vld [vmem:[%s4848_s6 + $0xa0] sm:$0xff]  ;;  %v2396_v49 = vld [vmem:[%s4848_s6 + $0xb0] sm:$0xff] }
 0x586   : > { %v2451_v26 = vadd.f32 %v2450_v59, %v2420_v55  ;;  %v2424_v35 = vmul.f32 %v2392_v14, %v2360_v20  ;;  %v2404_v20 = vld [vmem:[%s4848_s6 + $0xf0] sm:$0xff] }
 0x587   : > { %v2296_v41 = vpop.xlane.xlu1 %2295 }
 0x588   : > { %v2358_v31 = vadd.f32 %v2296_v41, %v4688_v48  ;;  %v2452_v48 = vadd.f32 %v2451_v26, %v2421_v43  ;;  %v2397_v41 = vld [vmem:[%s4848_s6 + $0xb8] sm:$0xff] }
 0x58a   : > { %v2422_v24 = vmul.f32 %v2390_v15, %v2358_v31  ;;  %v2402_v15 = vld [vmem:[%s4848_s6 + $0xe0] sm:$0xff] }
 0x58b   : > { %v2305_v25 = vpop.xlane.xlu1 %2304 }
 0x58c   : > { %v2453_v7 = vadd.f32 %v2452_v48, %v2422_v24  ;;  %v2361_v58 = vadd.f32 %v2305_v25, %v4690_v52  ;;  %v2403_v24 = vld [vmem:[%s4848_s6 + $0xe8] sm:$0xff] }
 0x58e   : > { %v2425_v21 = vmul.f32 %v2393_v13, %v2361_v58 }
 0x58f   : > { %v2299_v56 = vpop.xlane.xlu1 %2298 }
 0x590   : > { %v2359_v9 = vadd.f32 %v2299_v56, %v1449_v53  ;;  %v1479_v53 = vpop.xlane.xlu0 %1478 }
 0x592   : > { %v2423_v57 = vmul.f32 %v2391_v18, %v2359_v9 }
 0x593   : > { %v2314_v46 = vpop.xlane.xlu1 %2313 }
 0x594   : > { %v2454_v12 = vadd.f32 %v2453_v7, %v2423_v57  ;;  %v1473_v3 = vpop.xlane.xlu0 %1472  ;;  %v2364_v38 = vadd.f32 %v2314_v46, %v4704_v10  ;;  %v2398_v10 = vld [vmem:[%s4848_s6 + $0xc0] sm:$0xff] }
 0x596   : > { %v2455_v22 = vadd.f32 %v2454_v12, %v2424_v35  ;;  %v2428_v60 = vmul.f32 %v2396_v49, %v2364_v38  ;;  %v2581_v49 = vld [vmem:[%s4853_s11 + $0x38] sm:$0xff] }
 0x597   : > { %v2308_v61 = vpop.xlane.xlu1 %2307 }
 0x598   : > { %v2362_v6 = vadd.f32 %v2308_v61, %v1458_v28  ;;  %v2456_v28 = vadd.f32 %v2455_v22, %v2425_v21  ;;  %v1488_v17 = vpop.xlane.xlu0 %1487 }
 0x59a   : > { %v2426_v0 = vmul.f32 %v2394_v36, %v2362_v6  ;;  %v2481_v36 = vlaneseq }
 0x59b   : > { %v2317_v1 = vpop.xlane.xlu1 %2316 }
 0x59c   : > { %v2457_v62 = vadd.f32 %v2456_v28, %v2426_v0  ;;  %v2365_v16 = vadd.f32 %v2317_v1, %v4722_v23  ;;  %v1482_v11 = vpop.xlane.xlu0 %1481  ;;  %v2405_v1 = vld [vmem:[%s4848_s6 + $0xf8] sm:$0xff] }
 0x59e   : > { %v2429_v5 = vmul.f32 %v2397_v41, %v2365_v16  ;;  %v2576_v16 = vld [vmem:[%s4853_s11 + $0x10] sm:$0xff]  ;;  %v2574_v41 = vld [vmem:[%s4853_s11] sm:$0xff] }
 0x59f   : > { %v2311_v8 = vpop.xlane.xlu1 %2310 }
 0x5a0   : > { %v2363_v40 = vadd.f32 %v2311_v8, %v1461_v63  ;;  %v2399_v63 = vld [vmem:[%s4848_s6 + $0xc8] sm:$0xff]  ;;  %v1491_v55 = vpop.xlane.xlu0 %1490 }
 0x5a2   : > { %v2427_v27 = vmul.f32 %v2395_v33, %v2363_v40  ;;  %v2482_v40 = vshrl.u32 %v2481_v36, 7 }
 0x5a3   : > { %v2326_v52 = vpop.xlane.xlu1 %2325 }
 0x5a4   : > { %v2458_v45 = vadd.f32 %v2457_v62, %v2427_v27  ;;  %v2368_v34 = vadd.f32 %v2326_v52, %v1476_v37  ;;  %v1485_v43 = vpop.xlane.xlu0 %1484  ;;  %v2483_v0 = vsub.s32 0, %v2482_v40 }
 0x5a6   : > { %v2459_v32 = vadd.f32 %v2458_v45, %v2428_v60  ;;  %v2432_v4 = vmul.f32 %v2400_v54, %v2368_v34  ;;  %v2579_v45 = vld [vmem:[%s4853_s11 + $0x28] sm:$0xff]  ;;  %v2577_v60 = vld [vmem:[%s4853_s11 + $0x18] sm:$0xff] }
 0x5a7   : > { %v2320_v44 = vpop.xlane.xlu1 %2319 }
 0x5a8   : > { %v2366_v2 = vadd.f32 %v2320_v44, %v1470_v29  ;;  %v2460_v23 = vadd.f32 %v2459_v32, %v2429_v5  ;;  %v2580_v44 = vld [vmem:[%s4853_s11 + $0x30] sm:$0xff] }
 0x5aa   : > { %v2430_v19 = vmul.f32 %v2398_v10, %v2366_v2  ;;  %v2575_v2 = vld [vmem:[%s4853_s11 + $0x8] sm:$0xff]  ;;  %v2502_v10 = vld [vmem:[%s4852_s10] sm:$0x1] }
 0x5ab   : > { %v2329_v50 = vpop.xlane.xlu1 %2328 }
 0x5ac   : > { %v2461_v42 = vadd.f32 %v2460_v23, %v2430_v19  ;;  %v2369_v31 = vadd.f32 %v2329_v50, %v1479_v53 }
 0x5ae   : > { %v2433_v9 = vmul.f32 %v2401_v51, %v2369_v31 }
 0x5af   : > { %v2323_v25 = vpop.xlane.xlu1 %2322 }
 0x5b0   : > { %v2367_v30 = vadd.f32 %v2323_v25, %v1473_v3  ;;  %v2479_v3 = vpop.permute.xlu0 %2478 }
 0x5b1   : > { %v2484_v27 = vrot.slane %v2479_v3, %v2483_v0 }
 0x5b2   : > { %v2431_v47 = vmul.f32 %v2399_v63, %v2367_v30 }
 0x5b3   : > { %v2338_v56 = vpop.xlane.xlu1 %2337 }
 0x5b4   : > { %v2462_v59 = vadd.f32 %v2461_v42, %v2431_v47  ;;  %v2372_v61 = vadd.f32 %v2338_v56, %v1488_v17  ;;  %v2578_v17 = vld [vmem:[%s4853_s11 + $0x20] sm:$0xff] }
 0x5b6   : > { %v2463_v46 = vadd.f32 %v2462_v59, %v2432_v4  ;;  %v2436_v53 = vmul.f32 %v2404_v20, %v2372_v61 }
 0x5b7   : > { %v2332_v37 = vpop.xlane.xlu1 %2331 }
 0x5b8   : > { %v2370_v26 = vadd.f32 %v2332_v37, %v1482_v11  ;;  %v2464_v48 = vadd.f32 %v2463_v46, %v2433_v9  ;;  %v2582_v11 = vld [vmem:[%s4854_s12] sm:$0x1] }
 0x5ba   : > { %v2434_v18 = vmul.f32 %v2402_v15, %v2370_v26 }
 0x5bb   : > { %v2335_v29 = vpop.xlane.xlu1 %2334 }
 0x5bc   : > { %v2371_v57 = vadd.f32 %v2335_v29, %v1485_v43  ;;  %v2465_v7 = vadd.f32 %v2464_v48, %v2434_v18 }
 0x5be   : > { %v2435_v14 = vmul.f32 %v2403_v24, %v2371_v57 }
 0x5bf   : > { %v2341_v12 = vpop.xlane.xlu1 %2340 }
 0x5c0   : > { %v2466_v35 = vadd.f32 %v2465_v7, %v2435_v14  ;;  %v2373_v58 = vadd.f32 %v2341_v12, %v1491_v55 }
 0x5c2   : > { %v2437_v6 = vmul.f32 %v2405_v1, %v2373_v58  ;;  %v2467_v13 = vadd.f32 %v2466_v35, %v2436_v53 }
 0x5c4   : > { %v2468_v8 = vadd.f32 %v2467_v13, %v2437_v6 }
 0x5c6   : > { %v2469_v22 = vrot.slane %v2468_v8, 4 }
 0x5c8   : > { %v2470_v33 = vadd.f32 %v2469_v22, %v2468_v8 }
 0x5ca   : > { %v2471_v21 = vrot.slane %v2470_v33, 2 }
 0x5cc   : > { %v2472_v52 = vadd.f32 %v2471_v21, %v2470_v33 }
 0x5ce   : > { %v2473_v28 = vrot.slane %v2472_v52, 1 }
 0x5d0   : > { %v2474_v38 = vadd.f32 %v2473_v28, %v2472_v52 }
 0x5d2   : > { %v2485_v62 = vadd.f32 %v2484_v27, %v2474_v38 }
 0x5d4   : > { %3314 = vmatmul.mubr.f32.vlgmr.msra.gmra.mxu1 %v2485_v62 }
 0x5d5   : > { %3317 = vmatpush3.msra.mxu1 %v2581_v49  ;;  %3332 = vmatprep.mubr.msk.f32.mxu1 %vm3411_vm3, %v3410_v39 }
 0x5d6   : > { %3318 = vmatprep.subr.mxu1 %v3410_v39 }
 0x5d7   : > { %3319 = vmatpush3.msra.mxu1 %v2580_v44 }
 0x5d8   : > { %3320 = vmatprep.subr.mxu1 %v3410_v39 }
 0x5d9   : > { %3321 = vmatpush3.msra.mxu1 %v2579_v45 }
 0x5da   : > { %3322 = vmatprep.subr.mxu1 %v3410_v39 }
 0x5db   : > { %3323 = vmatpush3.msra.mxu1 %v2578_v17 }
 0x5dc   : > { %3324 = vmatprep.subr.mxu1 %v3410_v39 }
 0x5dd   : > { %3325 = vmatpush3.msra.mxu1 %v2577_v60 }
 0x5de   : > { %3326 = vmatprep.subr.mxu1 %v3410_v39 }
 0x5df   : > { %3327 = vmatpush3.msra.mxu1 %v2576_v16 }
 0x5e0   : > { %3328 = vmatprep.subr.mxu1 %v3410_v39 }
 0x5e1   : > { %3329 = vmatpush3.msra.mxu1 %v2575_v2 }
 0x5e2   : > { %3330 = vmatprep.subr.mxu1 %v3410_v39 }
 0x5e3   : > { %3331 = vmatpush3.msra.mxu1 %v2574_v41 }
 0x694   : > { %v2569_v50 = vpop.f32.mrf.mxu1 }
 0x695   : > { %v2570_v32 = vadd.f32 %v2569_v50, %v2502_v10 }
 0x696   : > { %v3315_v5 = vpop.f32.mrf.mxu1 }
 0x697   : > { %v2573_v19 = vmax.f32 %v2570_v32, 0.0 }
 0x699   : > { %3333 = vmatmul.mubr.msk.f32.vlgmr.msra.gmra.mxu1 %vm2583_vm4, %v2573_v19 }
 0x759   : > { %v2653_v39 = vpop.f32.mrf.mxu1 }
 0x75a   : > { %v2654_v63 = vadd.f32 %v2653_v39, %v2582_v11 }
 0x75b   : > { %v3334_v25 = vpop.f32.mrf.mxu1 }
 0x75c   : > { %2657 = vst [vmem:[%s438_s25] sm:$0x1] %v2654_v63 }
 0x75d PF: > { %s25_s27 = sadd.s32 1, %s3407_s27  }
 0x75e   : > { %p22_p4 = scmp.ge.s32.totalorder %s25_s27, 10  }
 0x760   :  { %24 = sbr.rel (!%p22_p4) target bundleno = 3 (0x3), region = 103 }

</bundles_post_ra>
